<compile_context>
chip_gen: v5e
topology: v5e:2x2
jax: 0.10.0
libtpu: 0.0.40
codegen_flags: <defaults>
</compile_context>

<pallas_src>
import jax
import jax.numpy as jnp
from jax.experimental import pallas as pl
from jax.experimental.pallas import tpu as pltpu

# ---------------- small-but-faithful config (ViT-tiny scaled down) ----------
B = 2            # batch
C = 3            # input channels
IMG = 32         # image side (ref: 224)
P = 8            # patch size (ref: 16)
GH = GW = IMG // P
NP = GH * GW     # number of patches
S = NP + 1       # sequence length incl. cls token
D = 32           # embed dim (ref: 192)
HEADS = 4        # ref timm default: 12 heads
HEAD_DIM = D // HEADS
DEPTH = 2        # ref: 12
MLP_HIDDEN = 4 * D
NUM_CLASSES = 10  # ref: 100
LN_EPS = 1e-6     # timm LayerNorm eps
CPP = C * P * P   # im2col patch length


# ----------------------------- in-kernel helpers -----------------------------
def _ln(x, g, b):
    # torch LayerNorm: biased variance, eps inside rsqrt
    mu = jnp.mean(x, axis=-1, keepdims=True)
    xc = x - mu
    var = jnp.mean(xc * xc, axis=-1, keepdims=True)
    return xc * jax.lax.rsqrt(var + LN_EPS) * g + b


# ----------------------------- fused ViT kernel ------------------------------
def _vit_kernel(
    xp_ref, w_pe_ref, cpos_ref,                                   # patch embed
    ln1_g_ref, ln1_b_ref, w_qkv_ref, b_qkv_ref, w_proj_ref, b_proj_ref,
    ln2_g_ref, ln2_b_ref, w_fc1_ref, b_fc1_ref, w_fc2_ref, b_fc2_ref,
    lnf_g_ref, lnf_b_ref, w_head_ref, b_head_ref,                 # final LN + fc
    out_ref,
    z_ref,                                                        # VMEM (S, D)
):
    l = pl.program_id(1)                                          # layer index

    # ---- layer 0: tokenize this batch element (patch embed + cls + pos) ----
    # xp row 0 is all-zero (cls slot); cpos row 0 = cls + pos[0],
    # rows 1.. = pos[1:] + conv bias, so a single matmul+add builds z.
    @pl.when(l == 0)
    def _():
        z_ref[...] = (
            jnp.dot(xp_ref[0], w_pe_ref[...], preferred_element_type=jnp.float32)
            + cpos_ref[...]
        )

    z = z_ref[...]                                                # (S, D)

    # ---------------- attention branch (pre-norm) ----------------
    y = _ln(z, ln1_g_ref[0], ln1_b_ref[0])                        # (S, D)
    qkv = (jnp.dot(y, w_qkv_ref[0], preferred_element_type=jnp.float32)
           + b_qkv_ref[0])                                        # (S, 3D)

    wp = w_proj_ref[0]                                            # (D, D)
    attn = jnp.zeros((S, D), jnp.float32)
    for h in range(HEADS):                                        # static unroll
        lo = h * HEAD_DIM
        hi = lo + HEAD_DIM
        q = qkv[:, lo:hi]                     # softmax scale pre-folded into Wq
        k = qkv[:, D + lo:D + hi]
        v = qkv[:, 2 * D + lo:2 * D + hi]
        s = jax.lax.dot_general(q, k, (((1,), (1,)), ((), ())),
                                preferred_element_type=jnp.float32)   # (S, S)
        s = s - jnp.max(s, axis=-1, keepdims=True)
        p = jnp.exp(s)
        p = p * pl.reciprocal(jnp.sum(p, axis=-1, keepdims=True), approx=True)
        o_h = jnp.dot(p, v, preferred_element_type=jnp.float32)       # (S, Dh)
        # concat(o_h) @ Wproj  ==  sum_h o_h @ Wproj[rows_h]
        attn = attn + jnp.dot(o_h, wp[lo:hi, :],
                              preferred_element_type=jnp.float32)
    z = z + attn + b_proj_ref[0]                                  # residual

    # ---------------- MLP branch (pre-norm) ----------------
    y = _ln(z, ln2_g_ref[0], ln2_b_ref[0])
    hdn = (jnp.dot(y, w_fc1_ref[0], preferred_element_type=jnp.float32)
           + b_fc1_ref[0])
    # TODO(synk): torch nn.GELU() is the exact erf variant; erf lowering is not
    # guaranteed in Mosaic, so use the tanh approximation in-kernel (~1e-3 dev).
    hdn = 0.5 * hdn * (1.0 + jnp.tanh(
        0.7978845608028654 * (hdn + 0.044715 * hdn * hdn * hdn)))
    mo = (jnp.dot(hdn, w_fc2_ref[0], preferred_element_type=jnp.float32)
          + b_fc2_ref[0])
    z = z + mo                                                    # residual
    z_ref[...] = z

    # ---- last layer: final LN on the cls row + classification head ----
    @pl.when(l == DEPTH - 1)
    def _():
        cls_tok = z[0:1, :]                                       # (1, D)
        yc = _ln(cls_tok, lnf_g_ref[...], lnf_b_ref[...])
        logits = (jnp.dot(yc, w_head_ref[...], preferred_element_type=jnp.float32)
                  + b_head_ref[...])                              # (1, NUM_CLASSES)
        out_ref[0] = logits


# ----------------------------- parameter init --------------------------------
def init_params(key):
    def init(k, shape):
        return 0.02 * jax.random.normal(k, shape, jnp.float32)

    keys = iter(jax.random.split(key, 4 + 4 * DEPTH))
    params = {
        "conv_w": init(next(keys), (D, C, P, P)),     # Conv2d(C, D, P, stride=P)
        "conv_b": jnp.zeros((D,), jnp.float32),
        "cls":    init(next(keys), (1, 1, D)),
        "pos":    init(next(keys), (1, S, D)),
        "ln_g":   jnp.ones((D,), jnp.float32),
        "ln_b":   jnp.zeros((D,), jnp.float32),
        "w_fc":   init(next(keys), (D, NUM_CLASSES)),  # the outer `self.fc`
        "b_fc":   jnp.zeros((NUM_CLASSES,), jnp.float32),
        "blocks": [],
    }
    for _ in range(DEPTH):
        params["blocks"].append({
            "ln1_g": jnp.ones((D,), jnp.float32), "ln1_b": jnp.zeros((D,), jnp.float32),
            "w_qkv": init(next(keys), (D, 3 * D)), "b_qkv": jnp.zeros((3 * D,), jnp.float32),
            "w_proj": init(next(keys), (D, D)),    "b_proj": jnp.zeros((D,), jnp.float32),
            "ln2_g": jnp.ones((D,), jnp.float32), "ln2_b": jnp.zeros((D,), jnp.float32),
            "w_fc1": init(next(keys), (D, MLP_HIDDEN)), "b_fc1": jnp.zeros((MLP_HIDDEN,), jnp.float32),
            "w_fc2": init(next(keys), (MLP_HIDDEN, D)), "b_fc2": jnp.zeros((D,), jnp.float32),
        })
    return params


# ----------------------------- forward pass -----------------------------------
def forward(params, x):
    b = x.shape[0]

    # --- im2col for Conv2d(kernel=stride=P); prepend an all-zero "cls" row so
    #     the kernel builds z with a single matmul + add.
    xp = x.reshape(b, C, GH, P, GW, P).transpose(0, 2, 4, 1, 3, 5)
    xp = xp.reshape(b, NP, CPP)
    xp = jnp.concatenate([jnp.zeros((b, 1, CPP), xp.dtype), xp], axis=1)   # (B,S,CPP)

    w_pe = params["conv_w"].reshape(D, CPP).T                              # (CPP, D)
    # cpos row 0 = cls + pos[0]; rows 1.. = pos[1:] + conv bias
    cpos = jnp.concatenate(
        [params["cls"][0] + params["pos"][0, :1],
         params["pos"][0, 1:] + params["conv_b"][None, :]], axis=0)        # (S, D)

    # --- layer-stacked block weights; fold softmax scale into the Q columns.
    scale = HEAD_DIM ** -0.5
    stack = lambda name: jnp.stack([blk[name] for blk in params["blocks"]], axis=0)
    ln1_g = stack("ln1_g").reshape(DEPTH, 1, D)
    ln1_b = stack("ln1_b").reshape(DEPTH, 1, D)
    w_qkv = stack("w_qkv").at[:, :, :D].multiply(scale)                    # (L, D, 3D)
    b_qkv = stack("b_qkv").at[:, :D].multiply(scale).reshape(DEPTH, 1, 3 * D)
    w_proj = stack("w_proj")                                               # (L, D, D)
    b_proj = stack("b_proj").reshape(DEPTH, 1, D)
    ln2_g = stack("ln2_g").reshape(DEPTH, 1, D)
    ln2_b = stack("ln2_b").reshape(DEPTH, 1, D)
    w_fc1 = stack("w_fc1")                                                 # (L, D, H)
    b_fc1 = stack("b_fc1").reshape(DEPTH, 1, MLP_HIDDEN)
    w_fc2 = stack("w_fc2")                                                 # (L, H, D)
    b_fc2 = stack("b_fc2").reshape(DEPTH, 1, D)

    lnf_g = params["ln_g"].reshape(1, D)
    lnf_b = params["ln_b"].reshape(1, D)
    w_head = params["w_fc"]
    b_head = params["b_fc"].reshape(1, NUM_CLASSES)

    full = lambda shape: pl.BlockSpec(shape, lambda bi, li: (0,) * len(shape))
    per_layer = lambda shape: pl.BlockSpec(
        (1,) + shape, lambda bi, li: (li,) + (0,) * len(shape))

    out = pl.pallas_call(
        _vit_kernel,
        out_shape=jax.ShapeDtypeStruct((b, 1, NUM_CLASSES), jnp.float32),
        grid=(b, DEPTH),
        in_specs=[
            pl.BlockSpec((1, S, CPP), lambda bi, li: (bi, 0, 0)),   # xp (per batch)
            full((CPP, D)),                                         # w_pe
            full((S, D)),                                           # cpos
            per_layer((1, D)), per_layer((1, D)),                   # ln1 g/b
            per_layer((D, 3 * D)), per_layer((1, 3 * D)),           # qkv w/b
            per_layer((D, D)), per_layer((1, D)),                   # proj w/b
            per_layer((1, D)), per_layer((1, D)),                   # ln2 g/b
            per_layer((D, MLP_HIDDEN)), per_layer((1, MLP_HIDDEN)), # fc1 w/b
            per_layer((MLP_HIDDEN, D)), per_layer((1, D)),          # fc2 w/b
            full((1, D)), full((1, D)),                             # final LN g/b
            full((D, NUM_CLASSES)), full((1, NUM_CLASSES)),         # head w/b
        ],
        out_specs=pl.BlockSpec((1, 1, NUM_CLASSES), lambda bi, li: (bi, 0, 0)),
        scratch_shapes=[pltpu.VMEM((S, D), jnp.float32)],           # resident activation
        compiler_params=pltpu.CompilerParams(
            dimension_semantics=("parallel", "arbitrary")),
    )(xp, w_pe, cpos,
      ln1_g, ln1_b, w_qkv, b_qkv, w_proj, b_proj,
      ln2_g, ln2_b, w_fc1, b_fc1, w_fc2, b_fc2,
      lnf_g, lnf_b, w_head, b_head)

    return out.reshape(b, NUM_CLASSES)


if __name__ == "__main__":
    key = jax.random.PRNGKey(0)
    pkey, xkey = jax.random.split(key)
    params = init_params(pkey)
    x = jax.random.normal(xkey, (B, C, IMG, IMG), jnp.float32)   # NCHW like PyTorch

    out = jax.jit(forward)(params, x)
    out = jax.block_until_ready(out)
    assert out.shape == (B, NUM_CLASSES), out.shape
    print("KERNEL_OK")
</pallas_src>

<mosaic_0001>
module attributes {stable_mosaic.version = 11 : i64} {
  func.func @_vit_kernel(%arg0: i32, %arg1: i32, %arg2: memref<1x17x192xf32, #tpu.memory_space<vmem>>, %arg3: memref<192x32xf32, #tpu.memory_space<vmem>>, %arg4: memref<17x32xf32, #tpu.memory_space<vmem>>, %arg5: memref<1x1x32xf32, #tpu.memory_space<vmem>>, %arg6: memref<1x1x32xf32, #tpu.memory_space<vmem>>, %arg7: memref<1x32x96xf32, #tpu.memory_space<vmem>>, %arg8: memref<1x1x96xf32, #tpu.memory_space<vmem>>, %arg9: memref<1x32x32xf32, #tpu.memory_space<vmem>>, %arg10: memref<1x1x32xf32, #tpu.memory_space<vmem>>, %arg11: memref<1x1x32xf32, #tpu.memory_space<vmem>>, %arg12: memref<1x1x32xf32, #tpu.memory_space<vmem>>, %arg13: memref<1x32x128xf32, #tpu.memory_space<vmem>>, %arg14: memref<1x1x128xf32, #tpu.memory_space<vmem>>, %arg15: memref<1x128x32xf32, #tpu.memory_space<vmem>>, %arg16: memref<1x1x32xf32, #tpu.memory_space<vmem>>, %arg17: memref<1x32xf32, #tpu.memory_space<vmem>>, %arg18: memref<1x32xf32, #tpu.memory_space<vmem>>, %arg19: memref<32x10xf32, #tpu.memory_space<vmem>>, %arg20: memref<1x10xf32, #tpu.memory_space<vmem>>, %arg21: memref<1x1x10xf32, #tpu.memory_space<vmem>>, %arg22: memref<17x32xf32, #tpu.memory_space<vmem>>) attributes {dimension_semantics = [#tpu.dimension_semantics<parallel>, #tpu.dimension_semantics<arbitrary>], iteration_bounds = array<i64: 2, 2>, scalar_prefetch = 0 : i64, scratch_operands = 1 : i64, tpu.core_type = #tpu.core_type<tc>, window_params = [{transform_indices = @transform_0, window_bounds = array<i64: 1, 17, 192>}, {pipeline_mode = #tpu.pipeline_mode<synchronous>, transform_indices = @transform_1, window_bounds = array<i64: 192, 32>}, {pipeline_mode = #tpu.pipeline_mode<synchronous>, transform_indices = @transform_2, window_bounds = array<i64: 17, 32>}, {transform_indices = @transform_3, window_bounds = array<i64: 1, 1, 32>}, {transform_indices = @transform_4, window_bounds = array<i64: 1, 1, 32>}, {transform_indices = @transform_5, window_bounds = array<i64: 1, 32, 96>}, {transform_indices = @transform_6, window_bounds = array<i64: 1, 1, 96>}, {transform_indices = @transform_7, window_bounds = array<i64: 1, 32, 32>}, {transform_indices = @transform_8, window_bounds = array<i64: 1, 1, 32>}, {transform_indices = @transform_9, window_bounds = array<i64: 1, 1, 32>}, {transform_indices = @transform_10, window_bounds = array<i64: 1, 1, 32>}, {transform_indices = @transform_11, window_bounds = array<i64: 1, 32, 128>}, {transform_indices = @transform_12, window_bounds = array<i64: 1, 1, 128>}, {transform_indices = @transform_13, window_bounds = array<i64: 1, 128, 32>}, {transform_indices = @transform_14, window_bounds = array<i64: 1, 1, 32>}, {pipeline_mode = #tpu.pipeline_mode<synchronous>, transform_indices = @transform_15, window_bounds = array<i64: 1, 32>}, {pipeline_mode = #tpu.pipeline_mode<synchronous>, transform_indices = @transform_16, window_bounds = array<i64: 1, 32>}, {pipeline_mode = #tpu.pipeline_mode<synchronous>, transform_indices = @transform_17, window_bounds = array<i64: 32, 10>}, {pipeline_mode = #tpu.pipeline_mode<synchronous>, transform_indices = @transform_18, window_bounds = array<i64: 1, 10>}, {transform_indices = @transform_19, window_bounds = array<i64: 1, 1, 10>}]} {
    %c0_i32 = arith.constant 0 : i32
    %0 = arith.cmpi eq, %arg1, %c0_i32 : i32
    %1 = arith.extui %0 : i1 to i32
    %c0_i32_0 = arith.constant 0 : i32
    %2 = arith.cmpi ne, %1, %c0_i32_0 : i32
    scf.if %2 {
      %c0_78 = arith.constant 0 : index
      %c0_79 = arith.constant 0 : index
      %c0_80 = arith.constant 0 : index
      %171 = vector.load %arg2[%c0_78, %c0_79, %c0_80] : memref<1x17x192xf32, #tpu.memory_space<vmem>>, vector<1x17x192xf32>
      %172 = vector.shape_cast %171 : vector<1x17x192xf32> to vector<17x192xf32>
      %c0_81 = arith.constant 0 : index
      %c0_82 = arith.constant 0 : index
      %173 = vector.load %arg3[%c0_81, %c0_82] : memref<192x32xf32, #tpu.memory_space<vmem>>, vector<192x32xf32>
      %cst_83 = arith.constant dense<0.000000e+00> : vector<17x32xf32>
      %174 = tpu.matmul %172, %173, %cst_83 {dimension_numbers = #tpu.dot_dimension_numbers<[1], [0], [0], [1], [0, 0, 1, 1], [], []>} : vector<17x192xf32>, vector<192x32xf32>, vector<17x32xf32> -> vector<17x32xf32>
      %c0_84 = arith.constant 0 : index
      %c0_85 = arith.constant 0 : index
      %175 = vector.load %arg4[%c0_84, %c0_85] : memref<17x32xf32, #tpu.memory_space<vmem>>, vector<17x32xf32>
      %176 = arith.addf %174, %175 : vector<17x32xf32>
      %c0_86 = arith.constant 0 : index
      %c0_87 = arith.constant 0 : index
      %177 = vector.load %arg22[%c0_86, %c0_87] : memref<17x32xf32, #tpu.memory_space<vmem>>, vector<17x32xf32>
      tpu.vector_store %arg22[%c0_86, %c0_87], %176 {strides = array<i32>} : memref<17x32xf32, #tpu.memory_space<vmem>>, vector<17x32xf32>,
    } else {
    }
    %c0 = arith.constant 0 : index
    %c0_1 = arith.constant 0 : index
    %3 = vector.load %arg22[%c0, %c0_1] : memref<17x32xf32, #tpu.memory_space<vmem>>, vector<17x32xf32>
    %c0_2 = arith.constant 0 : index
    %c0_3 = arith.constant 0 : index
    %c0_4 = arith.constant 0 : index
    %4 = vector.load %arg5[%c0_2, %c0_3, %c0_4] : memref<1x1x32xf32, #tpu.memory_space<vmem>>, vector<1x1x32xf32>
    %5 = vector.shape_cast %4 : vector<1x1x32xf32> to vector<1x32xf32>
    %c0_5 = arith.constant 0 : index
    %c0_6 = arith.constant 0 : index
    %c0_7 = arith.constant 0 : index
    %6 = vector.load %arg6[%c0_5, %c0_6, %c0_7] : memref<1x1x32xf32, #tpu.memory_space<vmem>>, vector<1x1x32xf32>
    %7 = vector.shape_cast %6 : vector<1x1x32xf32> to vector<1x32xf32>
    %cst = arith.constant dense<0.000000e+00> : vector<17xf32>
    %8 = vector.multi_reduction <add>, %3, %cst [1] : vector<17x32xf32> to vector<17xf32>
    %9 = vector.shape_cast %8 : vector<17xf32> to vector<17x1xf32>
    %cst_8 = arith.constant 3.200000e+01 : f32
    %10 = vector.broadcast %cst_8 : f32 to vector<17x1xf32>
    %11 = arith.divf %9, %10 : vector<17x1xf32>
    %12 = vector.broadcast %11 : vector<17x1xf32> to vector<17x32xf32>
    %13 = arith.subf %3, %12 : vector<17x32xf32>
    %14 = arith.mulf %13, %13 : vector<17x32xf32>
    %cst_9 = arith.constant dense<0.000000e+00> : vector<17xf32>
    %15 = vector.multi_reduction <add>, %14, %cst_9 [1] : vector<17x32xf32> to vector<17xf32>
    %16 = vector.shape_cast %15 : vector<17xf32> to vector<17x1xf32>
    %cst_10 = arith.constant 3.200000e+01 : f32
    %17 = vector.broadcast %cst_10 : f32 to vector<17x1xf32>
    %18 = arith.divf %16, %17 : vector<17x1xf32>
    %cst_11 = arith.constant 9.99999997E-7 : f32
    %19 = vector.broadcast %cst_11 : f32 to vector<17x1xf32>
    %20 = arith.addf %18, %19 : vector<17x1xf32>
    %21 = math.rsqrt %20 : vector<17x1xf32>
    %22 = vector.broadcast %21 : vector<17x1xf32> to vector<17x32xf32>
    %23 = arith.mulf %13, %22 : vector<17x32xf32>
    %24 = vector.broadcast %5 : vector<1x32xf32> to vector<17x32xf32>
    %25 = arith.mulf %23, %24 : vector<17x32xf32>
    %26 = vector.broadcast %7 : vector<1x32xf32> to vector<17x32xf32>
    %27 = arith.addf %25, %26 : vector<17x32xf32>
    %c0_12 = arith.constant 0 : index
    %c0_13 = arith.constant 0 : index
    %c0_14 = arith.constant 0 : index
    %28 = vector.load %arg7[%c0_12, %c0_13, %c0_14] : memref<1x32x96xf32, #tpu.memory_space<vmem>>, vector<1x32x96xf32>
    %29 = vector.shape_cast %28 : vector<1x32x96xf32> to vector<32x96xf32>
    %cst_15 = arith.constant dense<0.000000e+00> : vector<17x96xf32>
    %30 = tpu.matmul %27, %29, %cst_15 {dimension_numbers = #tpu.dot_dimension_numbers<[1], [0], [0], [1], [0, 0, 1, 1], [], []>} : vector<17x32xf32>, vector<32x96xf32>, vector<17x96xf32> -> vector<17x96xf32>
    %c0_16 = arith.constant 0 : index
    %c0_17 = arith.constant 0 : index
    %c0_18 = arith.constant 0 : index
    %31 = vector.load %arg8[%c0_16, %c0_17, %c0_18] : memref<1x1x96xf32, #tpu.memory_space<vmem>>, vector<1x1x96xf32>
    %32 = vector.shape_cast %31 : vector<1x1x96xf32> to vector<1x96xf32>
    %33 = vector.broadcast %32 : vector<1x96xf32> to vector<17x96xf32>
    %34 = arith.addf %30, %33 : vector<17x96xf32>
    %c0_19 = arith.constant 0 : index
    %c0_20 = arith.constant 0 : index
    %c0_21 = arith.constant 0 : index
    %35 = vector.load %arg9[%c0_19, %c0_20, %c0_21] : memref<1x32x32xf32, #tpu.memory_space<vmem>>, vector<1x32x32xf32>
    %36 = vector.shape_cast %35 : vector<1x32x32xf32> to vector<32x32xf32>
    %cst_22 = arith.constant 0.000000e+00 : f32
    %37 = vector.broadcast %cst_22 : f32 to vector<17x32xf32>
    %38 = vector.extract_strided_slice %34 {offsets = [0, 0], sizes = [17, 8], strides = [1, 1]} : vector<17x96xf32> to vector<17x8xf32>
    %39 = vector.extract_strided_slice %34 {offsets = [0, 32], sizes = [17, 8], strides = [1, 1]} : vector<17x96xf32> to vector<17x8xf32>
    %40 = vector.extract_strided_slice %34 {offsets = [0, 64], sizes = [17, 8], strides = [1, 1]} : vector<17x96xf32> to vector<17x8xf32>
    %cst_23 = arith.constant dense<0.000000e+00> : vector<17x17xf32>
    %41 = tpu.matmul %38, %39, %cst_23 {dimension_numbers = #tpu.dot_dimension_numbers<[1], [1], [0], [0], [0, 0, 1, 0], [], []>} : vector<17x8xf32>, vector<17x8xf32>, vector<17x17xf32> -> vector<17x17xf32>
    %cst_24 = arith.constant dense<0xFF800000> : vector<17xf32>
    %42 = vector.multi_reduction <maximumf>, %41, %cst_24 [1] : vector<17x17xf32> to vector<17xf32>
    %43 = vector.shape_cast %42 : vector<17xf32> to vector<17x1xf32>
    %44 = vector.broadcast %43 : vector<17x1xf32> to vector<17x17xf32>
    %45 = arith.subf %41, %44 : vector<17x17xf32>
    %46 = math.exp %45 : vector<17x17xf32>
    %cst_25 = arith.constant dense<0.000000e+00> : vector<17xf32>
    %47 = vector.multi_reduction <add>, %46, %cst_25 [1] : vector<17x17xf32> to vector<17xf32>
    %48 = vector.shape_cast %47 : vector<17xf32> to vector<17x1xf32>
    %49 = tpu.reciprocal %48 {approx = true} : vector<17x1xf32> -> vector<17x1xf32>
    %50 = vector.broadcast %49 : vector<17x1xf32> to vector<17x17xf32>
    %51 = arith.mulf %46, %50 : vector<17x17xf32>
    %cst_26 = arith.constant dense<0.000000e+00> : vector<17x8xf32>
    %52 = tpu.matmul %51, %40, %cst_26 {dimension_numbers = #tpu.dot_dimension_numbers<[1], [0], [0], [1], [0, 0, 1, 1], [], []>} : vector<17x17xf32>, vector<17x8xf32>, vector<17x8xf32> -> vector<17x8xf32>
    %53 = vector.extract_strided_slice %36 {offsets = [0, 0], sizes = [8, 32], strides = [1, 1]} : vector<32x32xf32> to vector<8x32xf32>
    %cst_27 = arith.constant dense<0.000000e+00> : vector<17x32xf32>
    %54 = tpu.matmul %52, %53, %cst_27 {dimension_numbers = #tpu.dot_dimension_numbers<[1], [0], [0], [1], [0, 0, 1, 1], [], []>} : vector<17x8xf32>, vector<8x32xf32>, vector<17x32xf32> -> vector<17x32xf32>
    %55 = arith.addf %37, %54 : vector<17x32xf32>
    %56 = vector.extract_strided_slice %34 {offsets = [0, 8], sizes = [17, 8], strides = [1, 1]} : vector<17x96xf32> to vector<17x8xf32>
    %57 = vector.extract_strided_slice %34 {offsets = [0, 40], sizes = [17, 8], strides = [1, 1]} : vector<17x96xf32> to vector<17x8xf32>
    %58 = vector.extract_strided_slice %34 {offsets = [0, 72], sizes = [17, 8], strides = [1, 1]} : vector<17x96xf32> to vector<17x8xf32>
    %cst_28 = arith.constant dense<0.000000e+00> : vector<17x17xf32>
    %59 = tpu.matmul %56, %57, %cst_28 {dimension_numbers = #tpu.dot_dimension_numbers<[1], [1], [0], [0], [0, 0, 1, 0], [], []>} : vector<17x8xf32>, vector<17x8xf32>, vector<17x17xf32> -> vector<17x17xf32>
    %cst_29 = arith.constant dense<0xFF800000> : vector<17xf32>
    %60 = vector.multi_reduction <maximumf>, %59, %cst_29 [1] : vector<17x17xf32> to vector<17xf32>
    %61 = vector.shape_cast %60 : vector<17xf32> to vector<17x1xf32>
    %62 = vector.broadcast %61 : vector<17x1xf32> to vector<17x17xf32>
    %63 = arith.subf %59, %62 : vector<17x17xf32>
    %64 = math.exp %63 : vector<17x17xf32>
    %cst_30 = arith.constant dense<0.000000e+00> : vector<17xf32>
    %65 = vector.multi_reduction <add>, %64, %cst_30 [1] : vector<17x17xf32> to vector<17xf32>
    %66 = vector.shape_cast %65 : vector<17xf32> to vector<17x1xf32>
    %67 = tpu.reciprocal %66 {approx = true} : vector<17x1xf32> -> vector<17x1xf32>
    %68 = vector.broadcast %67 : vector<17x1xf32> to vector<17x17xf32>
    %69 = arith.mulf %64, %68 : vector<17x17xf32>
    %cst_31 = arith.constant dense<0.000000e+00> : vector<17x8xf32>
    %70 = tpu.matmul %69, %58, %cst_31 {dimension_numbers = #tpu.dot_dimension_numbers<[1], [0], [0], [1], [0, 0, 1, 1], [], []>} : vector<17x17xf32>, vector<17x8xf32>, vector<17x8xf32> -> vector<17x8xf32>
    %71 = vector.extract_strided_slice %36 {offsets = [8, 0], sizes = [8, 32], strides = [1, 1]} : vector<32x32xf32> to vector<8x32xf32>
    %cst_32 = arith.constant dense<0.000000e+00> : vector<17x32xf32>
    %72 = tpu.matmul %70, %71, %cst_32 {dimension_numbers = #tpu.dot_dimension_numbers<[1], [0], [0], [1], [0, 0, 1, 1], [], []>} : vector<17x8xf32>, vector<8x32xf32>, vector<17x32xf32> -> vector<17x32xf32>
    %73 = arith.addf %55, %72 : vector<17x32xf32>
    %74 = vector.extract_strided_slice %34 {offsets = [0, 16], sizes = [17, 8], strides = [1, 1]} : vector<17x96xf32> to vector<17x8xf32>
    %75 = vector.extract_strided_slice %34 {offsets = [0, 48], sizes = [17, 8], strides = [1, 1]} : vector<17x96xf32> to vector<17x8xf32>
    %76 = vector.extract_strided_slice %34 {offsets = [0, 80], sizes = [17, 8], strides = [1, 1]} : vector<17x96xf32> to vector<17x8xf32>
    %cst_33 = arith.constant dense<0.000000e+00> : vector<17x17xf32>
    %77 = tpu.matmul %74, %75, %cst_33 {dimension_numbers = #tpu.dot_dimension_numbers<[1], [1], [0], [0], [0, 0, 1, 0], [], []>} : vector<17x8xf32>, vector<17x8xf32>, vector<17x17xf32> -> vector<17x17xf32>
    %cst_34 = arith.constant dense<0xFF800000> : vector<17xf32>
    %78 = vector.multi_reduction <maximumf>, %77, %cst_34 [1] : vector<17x17xf32> to vector<17xf32>
    %79 = vector.shape_cast %78 : vector<17xf32> to vector<17x1xf32>
    %80 = vector.broadcast %79 : vector<17x1xf32> to vector<17x17xf32>
    %81 = arith.subf %77, %80 : vector<17x17xf32>
    %82 = math.exp %81 : vector<17x17xf32>
    %cst_35 = arith.constant dense<0.000000e+00> : vector<17xf32>
    %83 = vector.multi_reduction <add>, %82, %cst_35 [1] : vector<17x17xf32> to vector<17xf32>
    %84 = vector.shape_cast %83 : vector<17xf32> to vector<17x1xf32>
    %85 = tpu.reciprocal %84 {approx = true} : vector<17x1xf32> -> vector<17x1xf32>
    %86 = vector.broadcast %85 : vector<17x1xf32> to vector<17x17xf32>
    %87 = arith.mulf %82, %86 : vector<17x17xf32>
    %cst_36 = arith.constant dense<0.000000e+00> : vector<17x8xf32>
    %88 = tpu.matmul %87, %76, %cst_36 {dimension_numbers = #tpu.dot_dimension_numbers<[1], [0], [0], [1], [0, 0, 1, 1], [], []>} : vector<17x17xf32>, vector<17x8xf32>, vector<17x8xf32> -> vector<17x8xf32>
    %89 = vector.extract_strided_slice %36 {offsets = [16, 0], sizes = [8, 32], strides = [1, 1]} : vector<32x32xf32> to vector<8x32xf32>
    %cst_37 = arith.constant dense<0.000000e+00> : vector<17x32xf32>
    %90 = tpu.matmul %88, %89, %cst_37 {dimension_numbers = #tpu.dot_dimension_numbers<[1], [0], [0], [1], [0, 0, 1, 1], [], []>} : vector<17x8xf32>, vector<8x32xf32>, vector<17x32xf32> -> vector<17x32xf32>
    %91 = arith.addf %73, %90 : vector<17x32xf32>
    %92 = vector.extract_strided_slice %34 {offsets = [0, 24], sizes = [17, 8], strides = [1, 1]} : vector<17x96xf32> to vector<17x8xf32>
    %93 = vector.extract_strided_slice %34 {offsets = [0, 56], sizes = [17, 8], strides = [1, 1]} : vector<17x96xf32> to vector<17x8xf32>
    %94 = vector.extract_strided_slice %34 {offsets = [0, 88], sizes = [17, 8], strides = [1, 1]} : vector<17x96xf32> to vector<17x8xf32>
    %cst_38 = arith.constant dense<0.000000e+00> : vector<17x17xf32>
    %95 = tpu.matmul %92, %93, %cst_38 {dimension_numbers = #tpu.dot_dimension_numbers<[1], [1], [0], [0], [0, 0, 1, 0], [], []>} : vector<17x8xf32>, vector<17x8xf32>, vector<17x17xf32> -> vector<17x17xf32>
    %cst_39 = arith.constant dense<0xFF800000> : vector<17xf32>
    %96 = vector.multi_reduction <maximumf>, %95, %cst_39 [1] : vector<17x17xf32> to vector<17xf32>
    %97 = vector.shape_cast %96 : vector<17xf32> to vector<17x1xf32>
    %98 = vector.broadcast %97 : vector<17x1xf32> to vector<17x17xf32>
    %99 = arith.subf %95, %98 : vector<17x17xf32>
    %100 = math.exp %99 : vector<17x17xf32>
    %cst_40 = arith.constant dense<0.000000e+00> : vector<17xf32>
    %101 = vector.multi_reduction <add>, %100, %cst_40 [1] : vector<17x17xf32> to vector<17xf32>
    %102 = vector.shape_cast %101 : vector<17xf32> to vector<17x1xf32>
    %103 = tpu.reciprocal %102 {approx = true} : vector<17x1xf32> -> vector<17x1xf32>
    %104 = vector.broadcast %103 : vector<17x1xf32> to vector<17x17xf32>
    %105 = arith.mulf %100, %104 : vector<17x17xf32>
    %cst_41 = arith.constant dense<0.000000e+00> : vector<17x8xf32>
    %106 = tpu.matmul %105, %94, %cst_41 {dimension_numbers = #tpu.dot_dimension_numbers<[1], [0], [0], [1], [0, 0, 1, 1], [], []>} : vector<17x17xf32>, vector<17x8xf32>, vector<17x8xf32> -> vector<17x8xf32>
    %107 = vector.extract_strided_slice %36 {offsets = [24, 0], sizes = [8, 32], strides = [1, 1]} : vector<32x32xf32> to vector<8x32xf32>
    %cst_42 = arith.constant dense<0.000000e+00> : vector<17x32xf32>
    %108 = tpu.matmul %106, %107, %cst_42 {dimension_numbers = #tpu.dot_dimension_numbers<[1], [0], [0], [1], [0, 0, 1, 1], [], []>} : vector<17x8xf32>, vector<8x32xf32>, vector<17x32xf32> -> vector<17x32xf32>
    %109 = arith.addf %91, %108 : vector<17x32xf32>
    %110 = arith.addf %3, %109 : vector<17x32xf32>
    %c0_43 = arith.constant 0 : index
    %c0_44 = arith.constant 0 : index
    %c0_45 = arith.constant 0 : index
    %111 = vector.load %arg10[%c0_43, %c0_44, %c0_45] : memref<1x1x32xf32, #tpu.memory_space<vmem>>, vector<1x1x32xf32>
    %112 = vector.shape_cast %111 : vector<1x1x32xf32> to vector<1x32xf32>
    %113 = vector.broadcast %112 : vector<1x32xf32> to vector<17x32xf32>
    %114 = arith.addf %110, %113 : vector<17x32xf32>
    %c0_46 = arith.constant 0 : index
    %c0_47 = arith.constant 0 : index
    %c0_48 = arith.constant 0 : index
    %115 = vector.load %arg11[%c0_46, %c0_47, %c0_48] : memref<1x1x32xf32, #tpu.memory_space<vmem>>, vector<1x1x32xf32>
    %116 = vector.shape_cast %115 : vector<1x1x32xf32> to vector<1x32xf32>
    %c0_49 = arith.constant 0 : index
    %c0_50 = arith.constant 0 : index
    %c0_51 = arith.constant 0 : index
    %117 = vector.load %arg12[%c0_49, %c0_50, %c0_51] : memref<1x1x32xf32, #tpu.memory_space<vmem>>, vector<1x1x32xf32>
    %118 = vector.shape_cast %117 : vector<1x1x32xf32> to vector<1x32xf32>
    %cst_52 = arith.constant dense<0.000000e+00> : vector<17xf32>
    %119 = vector.multi_reduction <add>, %114, %cst_52 [1] : vector<17x32xf32> to vector<17xf32>
    %120 = vector.shape_cast %119 : vector<17xf32> to vector<17x1xf32>
    %cst_53 = arith.constant 3.200000e+01 : f32
    %121 = vector.broadcast %cst_53 : f32 to vector<17x1xf32>
    %122 = arith.divf %120, %121 : vector<17x1xf32>
    %123 = vector.broadcast %122 : vector<17x1xf32> to vector<17x32xf32>
    %124 = arith.subf %114, %123 : vector<17x32xf32>
    %125 = arith.mulf %124, %124 : vector<17x32xf32>
    %cst_54 = arith.constant dense<0.000000e+00> : vector<17xf32>
    %126 = vector.multi_reduction <add>, %125, %cst_54 [1] : vector<17x32xf32> to vector<17xf32>
    %127 = vector.shape_cast %126 : vector<17xf32> to vector<17x1xf32>
    %cst_55 = arith.constant 3.200000e+01 : f32
    %128 = vector.broadcast %cst_55 : f32 to vector<17x1xf32>
    %129 = arith.divf %127, %128 : vector<17x1xf32>
    %cst_56 = arith.constant 9.99999997E-7 : f32
    %130 = vector.broadcast %cst_56 : f32 to vector<17x1xf32>
    %131 = arith.addf %129, %130 : vector<17x1xf32>
    %132 = math.rsqrt %131 : vector<17x1xf32>
    %133 = vector.broadcast %132 : vector<17x1xf32> to vector<17x32xf32>
    %134 = arith.mulf %124, %133 : vector<17x32xf32>
    %135 = vector.broadcast %116 : vector<1x32xf32> to vector<17x32xf32>
    %136 = arith.mulf %134, %135 : vector<17x32xf32>
    %137 = vector.broadcast %118 : vector<1x32xf32> to vector<17x32xf32>
    %138 = arith.addf %136, %137 : vector<17x32xf32>
    %c0_57 = arith.constant 0 : index
    %c0_58 = arith.constant 0 : index
    %c0_59 = arith.constant 0 : index
    %139 = vector.load %arg13[%c0_57, %c0_58, %c0_59] : memref<1x32x128xf32, #tpu.memory_space<vmem>>, vector<1x32x128xf32>
    %140 = vector.shape_cast %139 : vector<1x32x128xf32> to vector<32x128xf32>
    %cst_60 = arith.constant dense<0.000000e+00> : vector<17x128xf32>
    %141 = tpu.matmul %138, %140, %cst_60 {dimension_numbers = #tpu.dot_dimension_numbers<[1], [0], [0], [1], [0, 0, 1, 1], [], []>} : vector<17x32xf32>, vector<32x128xf32>, vector<17x128xf32> -> vector<17x128xf32>
    %c0_61 = arith.constant 0 : index
    %c0_62 = arith.constant 0 : index
    %c0_63 = arith.constant 0 : index
    %142 = vector.load %arg14[%c0_61, %c0_62, %c0_63] : memref<1x1x128xf32, #tpu.memory_space<vmem>>, vector<1x1x128xf32>
    %143 = vector.shape_cast %142 : vector<1x1x128xf32> to vector<1x128xf32>
    %144 = vector.broadcast %143 : vector<1x128xf32> to vector<17x128xf32>
    %145 = arith.addf %141, %144 : vector<17x128xf32>
    %cst_64 = arith.constant 5.000000e-01 : f32
    %146 = vector.broadcast %cst_64 : f32 to vector<17x128xf32>
    %147 = arith.mulf %146, %145 : vector<17x128xf32>
    %cst_65 = arith.constant 4.471500e-02 : f32
    %148 = vector.broadcast %cst_65 : f32 to vector<17x128xf32>
    %149 = arith.mulf %148, %145 : vector<17x128xf32>
    %150 = arith.mulf %149, %145 : vector<17x128xf32>
    %151 = arith.mulf %150, %145 : vector<17x128xf32>
    %152 = arith.addf %145, %151 : vector<17x128xf32>
    %cst_66 = arith.constant 0.797884583 : f32
    %153 = vector.broadcast %cst_66 : f32 to vector<17x128xf32>
    %154 = arith.mulf %153, %152 : vector<17x128xf32>
    %155 = math.tanh %154 : vector<17x128xf32>
    %cst_67 = arith.constant 1.000000e+00 : f32
    %156 = vector.broadcast %cst_67 : f32 to vector<17x128xf32>
    %157 = arith.addf %156, %155 : vector<17x128xf32>
    %158 = arith.mulf %147, %157 : vector<17x128xf32>
    %c0_68 = arith.constant 0 : index
    %c0_69 = arith.constant 0 : index
    %c0_70 = arith.constant 0 : index
    %159 = vector.load %arg15[%c0_68, %c0_69, %c0_70] : memref<1x128x32xf32, #tpu.memory_space<vmem>>, vector<1x128x32xf32>
    %160 = vector.shape_cast %159 : vector<1x128x32xf32> to vector<128x32xf32>
    %cst_71 = arith.constant dense<0.000000e+00> : vector<17x32xf32>
    %161 = tpu.matmul %158, %160, %cst_71 {dimension_numbers = #tpu.dot_dimension_numbers<[1], [0], [0], [1], [0, 0, 1, 1], [], []>} : vector<17x128xf32>, vector<128x32xf32>, vector<17x32xf32> -> vector<17x32xf32>
    %c0_72 = arith.constant 0 : index
    %c0_73 = arith.constant 0 : index
    %c0_74 = arith.constant 0 : index
    %162 = vector.load %arg16[%c0_72, %c0_73, %c0_74] : memref<1x1x32xf32, #tpu.memory_space<vmem>>, vector<1x1x32xf32>
    %163 = vector.shape_cast %162 : vector<1x1x32xf32> to vector<1x32xf32>
    %164 = vector.broadcast %163 : vector<1x32xf32> to vector<17x32xf32>
    %165 = arith.addf %161, %164 : vector<17x32xf32>
    %166 = arith.addf %114, %165 : vector<17x32xf32>
    %c0_75 = arith.constant 0 : index
    %c0_76 = arith.constant 0 : index
    %167 = vector.load %arg22[%c0_75, %c0_76] : memref<17x32xf32, #tpu.memory_space<vmem>>, vector<17x32xf32>
    tpu.vector_store %arg22[%c0_75, %c0_76], %166 {strides = array<i32>} : memref<17x32xf32, #tpu.memory_space<vmem>>, vector<17x32xf32>,
    %c1_i32 = arith.constant 1 : i32
    %168 = arith.cmpi eq, %arg1, %c1_i32 : i32
    %169 = arith.extui %168 : i1 to i32
    %c0_i32_77 = arith.constant 0 : i32
    %170 = arith.cmpi ne, %169, %c0_i32_77 : i32
    scf.if %170 {
      %171 = vector.extract_strided_slice %166 {offsets = [0, 0], sizes = [1, 32], strides = [1, 1]} : vector<17x32xf32> to vector<1x32xf32>
      %c0_78 = arith.constant 0 : index
      %c0_79 = arith.constant 0 : index
      %172 = vector.load %arg17[%c0_78, %c0_79] : memref<1x32xf32, #tpu.memory_space<vmem>>, vector<1x32xf32>
      %c0_80 = arith.constant 0 : index
      %c0_81 = arith.constant 0 : index
      %173 = vector.load %arg18[%c0_80, %c0_81] : memref<1x32xf32, #tpu.memory_space<vmem>>, vector<1x32xf32>
      %cst_82 = arith.constant dense<0.000000e+00> : vector<1xf32>
      %174 = vector.multi_reduction <add>, %171, %cst_82 [1] : vector<1x32xf32> to vector<1xf32>
      %175 = vector.shape_cast %174 : vector<1xf32> to vector<1x1xf32>
      %cst_83 = arith.constant 3.200000e+01 : f32
      %176 = vector.broadcast %cst_83 : f32 to vector<1x1xf32>
      %177 = arith.divf %175, %176 : vector<1x1xf32>
      %178 = vector.broadcast %177 : vector<1x1xf32> to vector<1x32xf32>
      %179 = arith.subf %171, %178 : vector<1x32xf32>
      %180 = arith.mulf %179, %179 : vector<1x32xf32>
      %cst_84 = arith.constant dense<0.000000e+00> : vector<1xf32>
      %181 = vector.multi_reduction <add>, %180, %cst_84 [1] : vector<1x32xf32> to vector<1xf32>
      %182 = vector.shape_cast %181 : vector<1xf32> to vector<1x1xf32>
      %cst_85 = arith.constant 3.200000e+01 : f32
      %183 = vector.broadcast %cst_85 : f32 to vector<1x1xf32>
      %184 = arith.divf %182, %183 : vector<1x1xf32>
      %cst_86 = arith.constant 9.99999997E-7 : f32
      %185 = vector.broadcast %cst_86 : f32 to vector<1x1xf32>
      %186 = arith.addf %184, %185 : vector<1x1xf32>
      %187 = math.rsqrt %186 : vector<1x1xf32>
      %188 = vector.broadcast %187 : vector<1x1xf32> to vector<1x32xf32>
      %189 = arith.mulf %179, %188 : vector<1x32xf32>
      %190 = arith.mulf %189, %172 : vector<1x32xf32>
      %191 = arith.addf %190, %173 : vector<1x32xf32>
      %c0_87 = arith.constant 0 : index
      %c0_88 = arith.constant 0 : index
      %192 = vector.load %arg19[%c0_87, %c0_88] : memref<32x10xf32, #tpu.memory_space<vmem>>, vector<32x10xf32>
      %cst_89 = arith.constant dense<0.000000e+00> : vector<1x10xf32>
      %193 = tpu.matmul %191, %192, %cst_89 {dimension_numbers = #tpu.dot_dimension_numbers<[1], [0], [0], [1], [0, 0, 1, 1], [], []>} : vector<1x32xf32>, vector<32x10xf32>, vector<1x10xf32> -> vector<1x10xf32>
      %c0_90 = arith.constant 0 : index
      %c0_91 = arith.constant 0 : index
      %194 = vector.load %arg20[%c0_90, %c0_91] : memref<1x10xf32, #tpu.memory_space<vmem>>, vector<1x10xf32>
      %195 = arith.addf %193, %194 : vector<1x10xf32>
      %c0_92 = arith.constant 0 : index
      %c0_93 = arith.constant 0 : index
      %c0_94 = arith.constant 0 : index
      %196 = vector.load %arg21[%c0_92, %c0_93, %c0_94] : memref<1x1x10xf32, #tpu.memory_space<vmem>>, vector<1x1x10xf32>
      %197 = vector.shape_cast %196 : vector<1x1x10xf32> to vector<1x10xf32>
      %198 = vector.shape_cast %195 : vector<1x10xf32> to vector<1x1x10xf32>
      tpu.vector_store %arg21[%c0_92, %c0_93, %c0_94], %198 {strides = array<i32>} : memref<1x1x10xf32, #tpu.memory_space<vmem>>, vector<1x1x10xf32>,
    } else {
    }
    return
  }
  func.func @transform_0(%arg0: i32, %arg1: i32) -> (i32, i32, i32) {
    %c0_i32 = arith.constant 0 : i32
    %c0_i32_0 = arith.constant 0 : i32
    %c0_i32_1 = arith.constant 0 : i32
    return %arg0, %c0_i32, %c0_i32_0 : i32, i32, i32
  }
  func.func @transform_1(%arg0: i32, %arg1: i32) -> (i32, i32) {
    %c0_i32 = arith.constant 0 : i32
    %c0_i32_0 = arith.constant 0 : i32
    %c0_i32_1 = arith.constant 0 : i32
    return %c0_i32, %c0_i32_0 : i32, i32
  }
  func.func @transform_2(%arg0: i32, %arg1: i32) -> (i32, i32) {
    %c0_i32 = arith.constant 0 : i32
    %c0_i32_0 = arith.constant 0 : i32
    %c0_i32_1 = arith.constant 0 : i32
    return %c0_i32, %c0_i32_0 : i32, i32
  }
  func.func @transform_3(%arg0: i32, %arg1: i32) -> (i32, i32, i32) {
    %c0_i32 = arith.constant 0 : i32
    %c0_i32_0 = arith.constant 0 : i32
    %c0_i32_1 = arith.constant 0 : i32
    return %arg1, %c0_i32, %c0_i32_0 : i32, i32, i32
  }
  func.func @transform_4(%arg0: i32, %arg1: i32) -> (i32, i32, i32) {
    %c0_i32 = arith.constant 0 : i32
    %c0_i32_0 = arith.constant 0 : i32
    %c0_i32_1 = arith.constant 0 : i32
    return %arg1, %c0_i32, %c0_i32_0 : i32, i32, i32
  }
  func.func @transform_5(%arg0: i32, %arg1: i32) -> (i32, i32, i32) {
    %c0_i32 = arith.constant 0 : i32
    %c0_i32_0 = arith.constant 0 : i32
    %c0_i32_1 = arith.constant 0 : i32
    return %arg1, %c0_i32, %c0_i32_0 : i32, i32, i32
  }
  func.func @transform_6(%arg0: i32, %arg1: i32) -> (i32, i32, i32) {
    %c0_i32 = arith.constant 0 : i32
    %c0_i32_0 = arith.constant 0 : i32
    %c0_i32_1 = arith.constant 0 : i32
    return %arg1, %c0_i32, %c0_i32_0 : i32, i32, i32
  }
  func.func @transform_7(%arg0: i32, %arg1: i32) -> (i32, i32, i32) {
    %c0_i32 = arith.constant 0 : i32
    %c0_i32_0 = arith.constant 0 : i32
    %c0_i32_1 = arith.constant 0 : i32
    return %arg1, %c0_i32, %c0_i32_0 : i32, i32, i32
  }
  func.func @transform_8(%arg0: i32, %arg1: i32) -> (i32, i32, i32) {
    %c0_i32 = arith.constant 0 : i32
    %c0_i32_0 = arith.constant 0 : i32
    %c0_i32_1 = arith.constant 0 : i32
    return %arg1, %c0_i32, %c0_i32_0 : i32, i32, i32
  }
  func.func @transform_9(%arg0: i32, %arg1: i32) -> (i32, i32, i32) {
    %c0_i32 = arith.constant 0 : i32
    %c0_i32_0 = arith.constant 0 : i32
    %c0_i32_1 = arith.constant 0 : i32
    return %arg1, %c0_i32, %c0_i32_0 : i32, i32, i32
  }
  func.func @transform_10(%arg0: i32, %arg1: i32) -> (i32, i32, i32) {
    %c0_i32 = arith.constant 0 : i32
    %c0_i32_0 = arith.constant 0 : i32
    %c0_i32_1 = arith.constant 0 : i32
    return %arg1, %c0_i32, %c0_i32_0 : i32, i32, i32
  }
  func.func @transform_11(%arg0: i32, %arg1: i32) -> (i32, i32, i32) {
    %c0_i32 = arith.constant 0 : i32
    %c0_i32_0 = arith.constant 0 : i32
    %c0_i32_1 = arith.constant 0 : i32
    return %arg1, %c0_i32, %c0_i32_0 : i32, i32, i32
  }
  func.func @transform_12(%arg0: i32, %arg1: i32) -> (i32, i32, i32) {
    %c0_i32 = arith.constant 0 : i32
    %c0_i32_0 = arith.constant 0 : i32
    %c0_i32_1 = arith.constant 0 : i32
    return %arg1, %c0_i32, %c0_i32_0 : i32, i32, i32
  }
  func.func @transform_13(%arg0: i32, %arg1: i32) -> (i32, i32, i32) {
    %c0_i32 = arith.constant 0 : i32
    %c0_i32_0 = arith.constant 0 : i32
    %c0_i32_1 = arith.constant 0 : i32
    return %arg1, %c0_i32, %c0_i32_0 : i32, i32, i32
  }
  func.func @transform_14(%arg0: i32, %arg1: i32) -> (i32, i32, i32) {
    %c0_i32 = arith.constant 0 : i32
    %c0_i32_0 = arith.constant 0 : i32
    %c0_i32_1 = arith.constant 0 : i32
    return %arg1, %c0_i32, %c0_i32_0 : i32, i32, i32
  }
  func.func @transform_15(%arg0: i32, %arg1: i32) -> (i32, i32) {
    %c0_i32 = arith.constant 0 : i32
    %c0_i32_0 = arith.constant 0 : i32
    %c0_i32_1 = arith.constant 0 : i32
    return %c0_i32, %c0_i32_0 : i32, i32
  }
  func.func @transform_16(%arg0: i32, %arg1: i32) -> (i32, i32) {
    %c0_i32 = arith.constant 0 : i32
    %c0_i32_0 = arith.constant 0 : i32
    %c0_i32_1 = arith.constant 0 : i32
    return %c0_i32, %c0_i32_0 : i32, i32
  }
  func.func @transform_17(%arg0: i32, %arg1: i32) -> (i32, i32) {
    %c0_i32 = arith.constant 0 : i32
    %c0_i32_0 = arith.constant 0 : i32
    %c0_i32_1 = arith.constant 0 : i32
    return %c0_i32, %c0_i32_0 : i32, i32
  }
  func.func @transform_18(%arg0: i32, %arg1: i32) -> (i32, i32) {
    %c0_i32 = arith.constant 0 : i32
    %c0_i32_0 = arith.constant 0 : i32
    %c0_i32_1 = arith.constant 0 : i32
    return %c0_i32, %c0_i32_0 : i32, i32
  }
  func.func @transform_19(%arg0: i32, %arg1: i32) -> (i32, i32, i32) {
    %c0_i32 = arith.constant 0 : i32
    %c0_i32_0 = arith.constant 0 : i32
    %c0_i32_1 = arith.constant 0 : i32
    return %arg0, %c0_i32, %c0_i32_0 : i32, i32, i32
  }
}

</mosaic_0001>

<bundles_post_ra>
// kernel: forward.1
= control target key start
LH: loop header
LB: loop body
LE: loop exit
PB: predicated region body
PF: predicated region fallthrough
CT: control target
= control target key end

     0   :  { %s3319_s0 = inlined_call_operand.vmem [shape: f32[2,17,192], index: 0, kind: input, shape index: {}]   ;;  %s3320_s1 = inlined_call_operand.vmem [shape: f32[192,32], index: 1, kind: input, shape index: {}]   ;;  %s3321_s2 = inlined_call_operand.vmem [shape: f32[17,32], index: 2, kind: input, shape index: {}]   ;;  %s3322_s3 = inlined_call_operand.vmem [shape: f32[2,1,32], index: 3, kind: input, shape index: {}]   ;;  %s3323_s4 = inlined_call_operand.vmem [shape: f32[2,1,32], index: 4, kind: input, shape index: {}]   ;;  %s3324_s5 = inlined_call_operand.vmem [shape: f32[2,32,96], index: 5, kind: input, shape index: {}]   ;;  %s3325_s6 = inlined_call_operand.vmem [shape: f32[2,1,96], index: 6, kind: input, shape index: {}]   ;;  %s3326_s7 = inlined_call_operand.vmem [shape: f32[2,32,32], index: 7, kind: input, shape index: {}]   ;;  %s3327_s8 = inlined_call_operand.vmem [shape: f32[2,1,32], index: 8, kind: input, shape index: {}]   ;;  %s3328_s9 = inlined_call_operand.vmem [shape: f32[2,1,32], index: 9, kind: input, shape index: {}]   ;;  %s3329_s10 = inlined_call_operand.vmem [shape: f32[2,1,32], index: 10, kind: input, shape index: {}]   ;;  %s3330_s11 = inlined_call_operand.vmem [shape: f32[2,32,128], index: 11, kind: input, shape index: {}]   ;;  %s3331_s12 = inlined_call_operand.vmem [shape: f32[2,1,128], index: 12, kind: input, shape index: {}]   ;;  %s3332_s13 = inlined_call_operand.vmem [shape: f32[2,128,32], index: 13, kind: input, shape index: {}]   ;;  %s3333_s14 = inlined_call_operand.vmem [shape: f32[2,1,32], index: 14, kind: input, shape index: {}]   ;;  %s3334_s15 = inlined_call_operand.vmem [shape: f32[1,32], index: 15, kind: input, shape index: {}]   ;;  %s3335_s16 = inlined_call_operand.vmem [shape: f32[1,32], index: 16, kind: input, shape index: {}]   ;;  %s3336_s17 = inlined_call_operand.vmem [shape: f32[32,10], index: 17, kind: input, shape index: {}]   ;;  %s3337_s18 = inlined_call_operand.vmem [shape: f32[1,10], index: 18, kind: input, shape index: {}]   ;;  %s3338_s19 = inlined_call_operand.hbm [shape: f32[2,1,10], index: 19, kind: output, shape index: {}]  }
   0x1   :  { %3355 = sst [smem:[#allocation18_spill]] %s3319_s0 }
   0x2   :  { %3356 = sst [smem:[#allocation19_spill]] %s3320_s1 }
   0x3   :  { %3357 = sst [smem:[#allocation20_spill]] %s3321_s2 }
   0x4   :  { %3358 = sst [smem:[#allocation21_spill]] %s3322_s3 }
   0x5   :  { %3359 = sst [smem:[#allocation22_spill]] %s3324_s5 }
   0x6   :  { %3360 = sst [smem:[#allocation23_spill]] %s3326_s7 }
   0x7   :  { %3361 = sst [smem:[#allocation24_spill]] %s3334_s15 }
   0x8   :  { %3362 = sst [smem:[#allocation25_spill]] %s3335_s16 }
   0x9   :  { %3363 = sst [smem:[#allocation26_spill]] %s3336_s17 }
   0xa   :  { %3364 = sst [smem:[#allocation27_spill]] %s3337_s18 }
   0xb   :  { %3365 = sst [smem:[#allocation28_spill]] %s3338_s19 }
   0xc   :  { %24 = vsyncpa [#allocation4], 0 }
   0xd   :  { %26 = vsyncpa [#allocation4 + $0x1], 0  ;;  %s2686_s0 = smov 0   ;;  %s2688_s30 = smov 0  }
   0xe   :  { %s2690_s20 = smov 0   ;;  %s2692_s21 = smov 0  }
   0xf   :  { %s2694_s1 = smov 0   ;;  %s2696_s22 = smov 0  }
  0x10   :  { %s2698_s2 = smov 0   ;;  %s2700_s23 = smov 0  }
  0x11 LB: > { %3366 = sst [smem:[#allocation6_spill]] %s2544_s0  ;;  %s2177_s24 = sadd.s32 4294967295, %s2572_s23   ;;  %s2572_s23 = sphi %s2700_s23, %s32_s23   ;;  %s2568_s2 = sphi %s2698_s2, %s3416_s2   ;;  %s2564_s22 = sphi %s2696_s22, %s3415_s22   ;;  %s2560_s1 = sphi %s2694_s1, %s3414_s1   ;;  %s2556_s21 = sphi %s2692_s21, %s3413_s21   ;;  %s2552_s20 = sphi %s2690_s20, %s3412_s20   ;;  %s2548_s30 = sphi %s2688_s30, %s3418_s30   ;;  %s2544_s0 = sphi %s2686_s0, %s3417_s0  }
  0x12   : > { %3367 = sst [smem:[#allocation7_spill]] %s2552_s20  ;;  %s2178_s25 = sadd.s32 4294967294, %s2572_s23  }
  0x13   : > { %3368 = sst [smem:[#allocation8_spill]] %s2556_s21  ;;  %s41_s3 = sadd.s32 1, %s2564_s22 }
  0x14   : > { %3369 = sst [smem:[#allocation9_spill]] %s2560_s1  ;;  %p42_p0 = scmp.ge.s32.totalorder %s41_s3, 2 }
  0x15   : > { %3370 = sst [smem:[#allocation10_spill]] %s2564_s22  ;;  %s44_s26 = sadd.s32 1, %s2568_s2 }
  0x16   : > { %3371 = sst [smem:[#allocation11_spill]] %s2568_s2  ;;  %p525_p1 = scmp.ne.s32.totalorder %s2552_s20, %s2548_s30 }
  0x17   : > { %3372 = sst [smem:[#allocation12_spill]] %s2572_s23  ;;  %p526_p2 = scmp.eq.s32.totalorder %s2177_s24, 3 }
  0x18   : > { %s3420_s3 = smov (%p42_p0, %s41_s3), 0  ;;  %s3422_s26 = smov (!%p42_p0, %s44_s26), %s2568_s2 }
  0x19   : > { %3373 = sst [smem:[#allocation13_spill]] %s3420_s3  ;;  %p2735_p3 = por %p526_p2, %p525_p1 }
  0x1a   : > { %p531_p4 = scmp.ne.s32.totalorder %s2548_s30, %s2544_s0  ;;  %p46_p5 = scmp.ge.s32.totalorder %s3422_s26, 2 }
  0x1b   : > { %s3374_s27 = scalar_select %p2735_p3, 1, 0 }
  0x1c   : > { %p532_p6 = scmp.eq.s32.totalorder %s2178_s25, 3  ;;  %p2181_p7 = scmp.ge.s32.totalorder %s2572_s23, 1 }
  0x1d   : > { %3375 = sst [smem:[#allocation14_spill]] %s3374_s27  ;;  %p656_p8 = scmp.lt.s32.totalorder %s2572_s23, 5 }
  0x1e   : > { %s3424_s26 = smov (%p46_p5, %s3422_s26), 0  ;;  %p2745_p9 = por %p532_p6, %p531_p4 }
  0x1f   : > { %3376 = sst [smem:[#allocation15_spill]] %s3424_s26  ;;  %p657_p10 = pnand %p2181_p7, %p656_p8 }
  0x20   : > { %s3377_s28 = scalar_select %p2745_p9, 1, 0 }
  0x21   : > { %s512_s29 = ssub.s32 %s2568_s2, %s3424_s26  ;;  %s515_s24 = sadd.s32 1, %s2552_s20 }
  0x22   : > { %3378 = sst [smem:[#allocation16_spill]] %s3377_s28  ;;  %p513_p11 = scmp.eq.s32.totalorder %s512_s29, 0 }
  0x23   : > { %660 = sbr.rel (%p657_p10) target bundleno = 3018 (0xbca), region = 96  ;;  %p755_p12 = scmp.lt.s32.totalorder (!%p657_p10), %s2560_s1, 1 }
  0x24   : > { %s2753_s3 = scalar_select %p513_p11, %s2552_s20, %s515_s24  }
  0x25   : > { %p760_p13 = scmp.lt.s32.totalorder (!%p657_p10), %s2556_s21, 1  ;;  %s3381_s19 = sld [smem:[#allocation18_spill]] (!%p657_p10) }
  0x26   : > { %3379 = sst [smem:[#allocation17_spill]] %s2753_s3  ;;  %s3384_s15 = sand.u32 (!%p657_p10), 1, %s2548_s30  }
  0x27   : > { %s3382_s5 = sld [smem:[#allocation22_spill]] (!%p657_p10)  ;;  %s2823_s16 = scalar_lea.vmem (!%p657_p10), [#allocation3], %s3384_s15 }
  0x28   : > { %s756_s22 = scalar_select %p755_p12, %s2560_s1, 1 }
  0x29   : > { %s2760_s0 = scalar_select %p760_p13, %s2556_s21, 1 }
  0x2a   : > { %s2296_s29 = smul.u32 48, %s756_s22  ;;  %s3383_s7 = sld [smem:[#allocation23_spill]] }
  0x2b   : > { %s2257_s18 = sshll.u32 %s2760_s0, 5 }
  0x2c   : > { %s2773_s1 = scalar_lea.vmem %s3381_s19, %s2296_s29  ;;  %s2805_s22 = scalar_lea.vmem %s3330_s11, %s2257_s18 }
  0x2d   : > { %s2779_s17 = scalar_lea.vmem %s3382_s5, %s2257_s18  ;;  %s803_s19 = scalar_lea.vmem %s3333_s14, %s2760_s0 }
  0x2e   : > { %s3385_s5 = sld [smem:[#allocation8_spill]] }
  0x30   : > { %s2788_s20 = scalar_lea.vmem %s3383_s7, %s2257_s18  ;;  %s2260_s7 = sshll.u32 %s2760_s0, 7 }
  0x31   : > { %s2819_s29 = scalar_lea.vmem %s3332_s13, %s2260_s7 }
  0x34   : > { %p2191_p0 = scmp.ne.s32.totalorder %s3385_s5, 0 }
  0x35   : > { %s3386_s2 = sld [smem:[#allocation19_spill]] (!%p2191_p0) }
  0x36   : > { %807 = sbr.rel (%p2191_p0) target bundleno = 230 (0xe6), region = 100  ;;  %s3388_s21 = sld [smem:[#allocation20_spill]] (!%p2191_p0) }
  0x3b   : > { %s3387_s24 = smov %s3386_s2  ;;  %v829_v0 = vld [vmem:[%s3386_s2 + $0x78] sm:$0xff]  ;;  %v809_v17 = vld [vmem:[%s2773_s1 + $0x8] sm:$0xff]  ;;  %vm841_vm0 = vcmask 523264   ;;  %v808_v26 = vld [vmem:[%s2773_s1] sm:$0xff]  ;;  %vm903_vm1 = vcmask 261120   ;;  %vm906_vm2 = vcmask 253952  }
  0x3c   : > { %v828_v1 = vld [vmem:[%s3387_s24 + $0x70] sm:$0xff]  ;;  %851 = vmatpush.msra.mxu0 %v829_v0  ;;  %2261 = vmatpush.msra.mxu2 %v829_v0  ;;  %v837_v2 = vld [vmem:[%s3387_s24 + $0xb8] sm:$0xff]  ;;  %v827_v3 = vld [vmem:[%s3387_s24 + $0x68] sm:$0xff]  ;;  %s3389_s28 = smov %s3388_s21 }
  0x3d   : > { %2262 = vmatpush.msra.mxu3 %v829_v0  ;;  %885 = vmatpush.msra.mxu1 %v837_v2  ;;  %v836_v4 = vld [vmem:[%s3387_s24 + $0xb0] sm:$0xff]  ;;  %v835_v5 = vld [vmem:[%s3387_s24 + $0xa8] sm:$0xff]  ;;  %v826_v6 = vld [vmem:[%s3387_s24 + $0x60] sm:$0xff] }
  0x3e   : > { %852 = vmatpush.msra.mxu0 %v828_v1  ;;  %2263 = vmatpush.msra.mxu2 %v828_v1  ;;  %v834_v7 = vld [vmem:[%s3387_s24 + $0xa0] sm:$0xff]  ;;  %v825_v8 = vld [vmem:[%s3387_s24 + $0x58] sm:$0xff]  ;;  %v824_v10 = vld [vmem:[%s3387_s24 + $0x50] sm:$0xff] }
  0x3f   : > { %2264 = vmatpush.msra.mxu3 %v828_v1  ;;  %886 = vmatpush.msra.mxu1 %v836_v4  ;;  %v833_v9 = vld [vmem:[%s3387_s24 + $0x98] sm:$0xff]  ;;  %v832_v11 = vld [vmem:[%s3387_s24 + $0x90] sm:$0xff]  ;;  %v823_v12 = vld [vmem:[%s3387_s24 + $0x48] sm:$0xff] }
  0x40   : > { %853 = vmatpush.msra.mxu0 %v827_v3  ;;  %2265 = vmatpush.msra.mxu2 %v827_v3  ;;  %v831_v13 = vld [vmem:[%s3387_s24 + $0x88] sm:$0xff]  ;;  %v822_v14 = vld [vmem:[%s3387_s24 + $0x40] sm:$0xff]  ;;  %v821_v16 = vld [vmem:[%s3387_s24 + $0x38] sm:$0xff] }
  0x41   : > { %2266 = vmatpush.msra.mxu3 %v827_v3  ;;  %887 = vmatpush.msra.mxu1 %v835_v5  ;;  %v830_v15 = vld [vmem:[%s3387_s24 + $0x80] sm:$0xff]  ;;  %v820_v18 = vld [vmem:[%s3387_s24 + $0x30] sm:$0xff]  ;;  %v819_v19 = vld [vmem:[%s3387_s24 + $0x28] sm:$0xff] }
  0x42   : > { %854 = vmatpush.msra.mxu0 %v826_v6  ;;  %2267 = vmatpush.msra.mxu2 %v826_v6  ;;  %v818_v20 = vld [vmem:[%s3387_s24 + $0x20] sm:$0xff]  ;;  %v817_v21 = vld [vmem:[%s3387_s24 + $0x18] sm:$0xff]  ;;  %v816_v23 = vld [vmem:[%s3387_s24 + $0x10] sm:$0xff] }
  0x43   : > { %2268 = vmatpush.msra.mxu3 %v826_v6  ;;  %888 = vmatpush.msra.mxu1 %v834_v7  ;;  %v811_v22 = vld [vmem:[%s2773_s1 + $0x18] sm:$0xff]  ;;  %v815_v24 = vld [vmem:[%s3387_s24 + $0x8] sm:$0xff]  ;;  %v814_v25 = vld [vmem:[%s3387_s24] sm:$0xff] }
  0x44   : > { %855 = vmatpush.msra.mxu0 %v825_v8  ;;  %2269 = vmatpush.msra.mxu2 %v825_v8  ;;  %v810_v27 = vld [vmem:[%s2773_s1 + $0x10] sm:$0xff]  ;;  %v812_v28 = vld [vmem:[%s2773_s1 + $0x20] sm:$0x1]  ;;  %v813_v29 = vld [vmem:[%s2773_s1 + $0x28] sm:$0x1] }
  0x45   : > { %2270 = vmatpush.msra.mxu3 %v825_v8  ;;  %889 = vmatpush.msra.mxu1 %v833_v9  ;;  %v838_v32 = vld [vmem:[%s3388_s21] sm:$0xff]  ;;  %v839_v36 = vld [vmem:[%s3389_s28 + $0x8] sm:$0xff]  ;;  %v840_v37 = vld [vmem:[%s3389_s28 + $0x10] sm:$0x1] }
  0x46   : > { %856 = vmatpush.msra.mxu0 %v824_v10  ;;  %2271 = vmatpush.msra.mxu2 %v824_v10 }
  0x47   : > { %2272 = vmatpush.msra.mxu3 %v824_v10  ;;  %890 = vmatpush.msra.mxu1 %v832_v11 }
  0x48   : > { %857 = vmatpush.msra.mxu0 %v823_v12  ;;  %2273 = vmatpush.msra.mxu2 %v823_v12 }
  0x49   : > { %2274 = vmatpush.msra.mxu3 %v823_v12  ;;  %891 = vmatpush.msra.mxu1 %v831_v13 }
  0x4a   : > { %858 = vmatpush.msra.mxu0 %v822_v14  ;;  %2275 = vmatpush.msra.mxu2 %v822_v14 }
  0x4b   : > { %2276 = vmatpush.msra.mxu3 %v822_v14  ;;  %892 = vmatpush.msra.mxu1 %v830_v15 }
  0x4c   : > { %859 = vmatpush.msra.mxu0 %v821_v16  ;;  %2277 = vmatpush.msra.mxu2 %v821_v16 }
  0x4d   : > { %2278 = vmatpush.msra.mxu3 %v821_v16  ;;  %2192 = vmatmul.msk.f32.vlgmr.msra.gmra.mxu1 %vm841_vm0, %v809_v17 }
  0x4e   : > { %860 = vmatpush.msra.mxu0 %v820_v18  ;;  %2279 = vmatpush.msra.mxu2 %v820_v18 }
  0x4f   : > { %2280 = vmatpush.msra.mxu3 %v820_v18 }
  0x50   : > { %861 = vmatpush.msra.mxu0 %v819_v19  ;;  %2281 = vmatpush.msra.mxu2 %v819_v19 }
  0x51   : > { %2282 = vmatpush.msra.mxu3 %v819_v19 }
  0x52   : > { %862 = vmatpush.msra.mxu0 %v818_v20  ;;  %2283 = vmatpush.msra.mxu2 %v818_v20 }
  0x53   : > { %2284 = vmatpush.msra.mxu3 %v818_v20 }
  0x54   : > { %863 = vmatpush.msra.mxu0 %v817_v21  ;;  %2285 = vmatpush.msra.mxu2 %v817_v21 }
  0x55   : > { %2286 = vmatpush.msra.mxu3 %v817_v21  ;;  %2193 = vmatmul.msk.f32.gmra.mxu1 %vm841_vm0, %v811_v22 }
  0x56   : > { %864 = vmatpush.msra.mxu0 %v816_v23  ;;  %2287 = vmatpush.msra.mxu2 %v816_v23 }
  0x57   : > { %2288 = vmatpush.msra.mxu3 %v816_v23 }
  0x58   : > { %865 = vmatpush.msra.mxu0 %v815_v24  ;;  %2289 = vmatpush.msra.mxu2 %v815_v24 }
  0x59   : > { %2290 = vmatpush.msra.mxu3 %v815_v24 }
  0x5a   : > { %866 = vmatpush.msra.mxu0 %v814_v25  ;;  %2291 = vmatpush.msra.mxu2 %v814_v25 }
  0x5b   : > { %2292 = vmatpush.msra.mxu3 %v814_v25  ;;  %867 = vmatmul.f32.vlgmr.msra.gmra.mxu0 %v808_v26 }
  0x5c   : > { %870 = vmatmul.f32.vlgmr.msra.gmra.mxu2 %v810_v27  ;;  %873 = vmatmul.f32.vlgmr.msra.gmra.mxu3 %v812_v28 }
  0x5d   : > { %2194 = vmatmul.msk.f32.gmra.mxu1 %vm841_vm0, %v813_v29 }
  0xca   : > { %v894_v30 = vpop.f32.mrf.mxu1 }
  0xd2   : > { %v897_v31 = vpop.f32.mrf.mxu1 }
  0xd8   : > { %v868_v33 = vpop.f32.mrf.mxu0 }
  0xd9   : > { %v869_v34 = vadd.f32 %v868_v33, %v838_v32 }
  0xda   : > { %v900_v38 = vpop.f32.mrf.mxu1 }
  0xdb   : > { %v895_v35 = vadd.f32 %v894_v30, %v869_v34 }
  0xdd   : > { %904 = vst.msk [vmem:[#allocation2] sm:$0xff] %vm903_vm1, %v895_v35 }
  0xdf   : > { %v871_v39 = vpop.f32.mrf.mxu2  ;;  %v874_v40 = vpop.f32.mrf.mxu3 }
  0xe0   : > { %v872_v41 = vadd.f32 %v871_v39, %v839_v36  ;;  %v875_v42 = vadd.f32 %v874_v40, %v840_v37 }
  0xe2   : > { %v898_v43 = vadd.f32 %v897_v31, %v872_v41  ;;  %v901_v44 = vadd.f32 %v900_v38, %v875_v42 }
  0xe4   : > { %905 = vst.msk [vmem:[#allocation2 + $0x8] sm:$0xff] %vm903_vm1, %v898_v43 }
  0xe5   : > { %907 = vst.msk [vmem:[#allocation2 + $0x10] sm:$0x1] %vm906_vm2, %v901_v44 }
  0xe6 PF: > { %v2916_v45 = vld [vmem:[#allocation2] sm:$0xff]  ;;  %vm913_vm3 = vcmask 261120   ;;  %vm920_vm4 = vcmask 253952   ;;  %v2574_v51 = vmov 32.0   ;;  %v1003_v9 = vld [vmem:[%s2779_s17 + $0x18] sm:$0xff]  ;;  %v1002_v10 = vld [vmem:[%s2779_s17 + $0x10] sm:$0xff]  ;;  %s3392_s5 = scalar_lea.vmem %s3323_s4, %s2760_s0  ;;  %s3393_s2 = scalar_lea.vmem %s3325_s6, %s2760_s0 }
  0xe7   : > { %v914_v47 = vsel %vm913_vm3, %v2916_v45, 0.0  ;;  %2408 = vrcp.f32 %v2574_v51  ;;  %1029 = vmatpush.msra.mxu0 %v1003_v9  ;;  %v1001_v11 = vld [vmem:[%s2779_s17 + $0x8] sm:$0xff]  ;;  %v1000_v12 = vld [vmem:[%s2779_s17] sm:$0xff]  ;;  %s3390_s27 = sld [smem:[#allocation21_spill]]  ;;  %s2575_s3 = smov 96   ;;  %vm1056_vm15 = vcmask 64512  }
  0xe8   : > { %915 = vadd.xlane.f32.xlu0 %v914_v47  ;;  %v2401_v34 = vld [vmem:[%s3392_s5] ss:$0 sm:$0xff]  ;;  %vm1095_vm0 = vcmask 138240   ;;  %vm1102_vm1 = vcmask 131072   ;;  %s2576_s1 = smov 64   ;;  %s2577_s7 = smov 88  }
  0xe9   : > { %1030 = vmatpush.msra.mxu0 %v1002_v10  ;;  %s2578_s17 = smov 120   ;;  %s2579_s23 = smov 80   ;;  %vm1147_vm2 = vcmask 1040384  }
  0xea   : > { %s2582_s25 = smov 104   ;;  %s2583_s26 = smov 56  }
  0xeb   : > { %v2924_v49 = vld [vmem:[#allocation2 + $0x8] sm:$0xff]  ;;  %1031 = vmatpush.msra.mxu0 %v1001_v11  ;;  %s2584_s5 = smov 40   ;;  %s2585_s18 = smov 48  }
  0xec   : > { %v2918_v46 = vld [vmem:[#allocation2 + $0x10] sm:$0x1]  ;;  %v917_v50 = vsel %vm913_vm3, %v2924_v49, 0.0 }
  0xed   : > { %v921_v48 = vsel %vm920_vm4, %v2918_v46, 0.0  ;;  %v2409_v52 = vpop.eup %2408  ;;  %1032 = vmatpush.msra.mxu0 %v1000_v12  ;;  %s3391_s15 = scalar_lea.vmem %s3390_s27, %s2760_s0  ;;  %s2580_s27 = smov 72  }
  0xee   : > { %922 = vadd.xlane.f32.xlu1 %v921_v48  ;;  %v925_v53 = vmul.f32 32.0, %v2409_v52  ;;  %vm929_vm5 = vweird.f32 %v2409_v52  ;;  %v2400_v30 = vld [vmem:[%s3391_s15] ss:$0 sm:$0xff]  ;;  %s2581_s15 = smov 112  }
  0xf0   : > { %918 = vadd.xlane.f32.xlu0 %v917_v50  ;;  %v926_v54 = vsub.f32 1.0, %v925_v53 }
  0xf2   : > { %v927_v55 = vmul.f32 %v2409_v52, %v926_v54 }
  0xf4   : > { %v928_v56 = vadd.f32 %v2409_v52, %v927_v55 }
  0xf6   : > { %v2928_v57 = vsel %vm929_vm5, %v2409_v52, %v928_v56 }
 0x15b   : > { %v916_v58 = vpop.xlane.xlu0 %915 }
 0x15c   : > { %v931_v59 = vmul.f32 %v2928_v57, %v916_v58  ;;  %v2402_v58 = vld [vmem:[%s3393_s2] ss:$0 sm:$0xff]  ;;  %s3394_s2 = scalar_lea.vmem %s3327_s8, %s2760_s0 }
 0x15e   : > { %v934_v60 = vsub.f32 %v2916_v45, %v931_v59 }
 0x160   : > { %v937_v61 = vmul.f32 %v934_v60, %v934_v60 }
 0x161   : > { %v923_v62 = vpop.xlane.xlu1 %922 }
 0x162   : > { %v940_v63 = vsel %vm913_vm3, %v937_v61, 0.0  ;;  %v933_v2 = vmul.f32 %v2928_v57, %v923_v62 }
 0x163   : > { %941 = vadd.xlane.f32.xlu1 %v940_v63  ;;  %v919_v0 = vpop.xlane.xlu0 %918 }
 0x164   : > { %v932_v1 = vmul.f32 %v2928_v57, %v919_v0  ;;  %v2937_v4 = vsub.f32 %v2918_v46, %v933_v2 }
 0x166   : > { %v935_v3 = vsub.f32 %v2924_v49, %v932_v1  ;;  %v939_v7 = vmul.f32 %v2937_v4, %v2937_v4 }
 0x168   : > { %v938_v5 = vmul.f32 %v935_v3, %v935_v3  ;;  %v946_v8 = vsel %vm920_vm4, %v939_v7, 0.0 }
 0x16a   : > { %v943_v6 = vsel %vm913_vm3, %v938_v5, 0.0 }
 0x16b   : > { %944 = vadd.xlane.f32.xlu2 %v943_v6 }
 0x173   : > { %947 = vadd.xlane.f32.xlu2 %v946_v8 }
 0x1d6   : > { %v942_v13 = vpop.xlane.xlu1 %941 }
 0x1d7   : > { %v949_v14 = vmul.f32 %v942_v13, %v2928_v57 }
 0x1d9   : > { %v952_v15 = vadd.f32 1e-06, %v949_v14 }
 0x1db   : > { %2410 = vrsqrt.f32 %v952_v15  ;;  %vm961_vm7 = vweird.f32 %v952_v15 }
 0x1de   : > { %v945_v16 = vpop.xlane.xlu2 %944 }
 0x1df   : > { %v950_v17 = vmul.f32 %v945_v16, %v2928_v57 }
 0x1e1   : > { %v2411_v18 = vpop.eup %2410  ;;  %v953_v19 = vadd.f32 1e-06, %v950_v17 }
 0x1e2   : > { %v956_v20 = vmul.f32 %v2411_v18, %v952_v15  ;;  %vm962_vm6 = vweird.f32 %v2411_v18 }
 0x1e3   : > { %2412 = vrsqrt.f32 %v953_v19  ;;  %vm963_vm8 = vmor %vm961_vm7, %vm962_vm6  ;;  %vm971_vm10 = vweird.f32 %v953_v19 }
 0x1e4   : > { %v957_v21 = vmul.f32 %v2411_v18, %v956_v20 }
 0x1e6   : > { %v958_v22 = vmul.f32 0.5, %v957_v21  ;;  %v948_v23 = vpop.xlane.xlu2 %947 }
 0x1e7   : > { %v951_v24 = vmul.f32 %v948_v23, %v2928_v57 }
 0x1e8   : > { %v959_v25 = vsub.f32 1.5, %v958_v22 }
 0x1e9   : > { %v2413_v26 = vpop.eup %2412  ;;  %v954_v27 = vadd.f32 1e-06, %v951_v24 }
 0x1ea   : > { %v960_v28 = vmul.f32 %v2411_v18, %v959_v25  ;;  %v966_v29 = vmul.f32 %v2413_v26, %v953_v19  ;;  %vm972_vm9 = vweird.f32 %v2413_v26 }
 0x1eb   : > { %2414 = vrsqrt.f32 %v954_v27  ;;  %vm973_vm11 = vmor %vm971_vm10, %vm972_vm9  ;;  %vm981_vm13 = vweird.f32 %v954_v27 }
 0x1ec   : > { %v964_v31 = vsel %vm963_vm8, %v2411_v18, %v960_v28  ;;  %v967_v32 = vmul.f32 %v2413_v26, %v966_v29 }
 0x1ed   : > { %v985_v33 = vmul.f32 %v964_v31, %v934_v60 }
 0x1ee   : > { %v968_v35 = vmul.f32 0.5, %v967_v32 }
 0x1ef   : > { %v991_v36 = vmul.f32 %v2400_v30, %v985_v33 }
 0x1f0   : > { %v969_v37 = vsub.f32 1.5, %v968_v35 }
 0x1f1   : > { %v2415_v38 = vpop.eup %2414  ;;  %v997_v39 = vadd.f32 %v2401_v34, %v991_v36 }
 0x1f2   : > { %v970_v40 = vmul.f32 %v2413_v26, %v969_v37  ;;  %v976_v41 = vmul.f32 %v2415_v38, %v954_v27  ;;  %vm982_vm12 = vweird.f32 %v2415_v38 }
 0x1f3   : > { %2195 = vmatmul.msk.f32.vlgmr.msra.gmra.mxu0 %vm913_vm3, %v997_v39  ;;  %vm983_vm14 = vmor %vm981_vm13, %vm982_vm12 }
 0x1f4   : > { %v974_v42 = vsel %vm973_vm11, %v2413_v26, %v970_v40  ;;  %v977_v43 = vmul.f32 %v2415_v38, %v976_v41 }
 0x1f5   : > { %v986_v44 = vmul.f32 %v974_v42, %v935_v3 }
 0x1f6   : > { %v978_v47 = vmul.f32 0.5, %v977_v43 }
 0x1f7   : > { %v992_v48 = vmul.f32 %v2400_v30, %v986_v44 }
 0x1f8   : > { %v979_v50 = vsub.f32 1.5, %v978_v47 }
 0x1f9   : > { %v998_v51 = vadd.f32 %v2401_v34, %v992_v48 }
 0x1fa   : > { %v980_v52 = vmul.f32 %v2415_v38, %v979_v50 }
 0x1fb   : > { %2196 = vmatmul.msk.f32.gmra.mxu0 %vm913_vm3, %v998_v51 }
 0x1fc   : > { %v984_v53 = vsel %vm983_vm14, %v2415_v38, %v980_v52 }
 0x1fd   : > { %v987_v54 = vmul.f32 %v984_v53, %v2937_v4 }
 0x1ff   : > { %v993_v55 = vmul.f32 %v2400_v30, %v987_v54 }
 0x201   : > { %v999_v56 = vadd.f32 %v2401_v34, %v993_v55  ;;  %v1043_v34 = vld [vmem:[%s2788_s20] sm:$0xff] }
 0x203   : > { %2197 = vmatmul.msk.f32.gmra.mxu0 %vm913_vm3, %v999_v56 }
 0x270   : > { %v1034_v59 = vpop.f32.mrf.mxu0 }
 0x271   : > { %v2969_v60 = vadd.f32 %v2402_v58, %v1034_v59 }
 0x273   : > { %1050 = vrot.lane.b32.xlu2 %v2969_v60, %s2575_s3 }
 0x278   : > { %v1037_v61 = vpop.f32.mrf.mxu0 }
 0x279   : > { %v2972_v62 = vadd.f32 %v2402_v58, %v1037_v61 }
 0x27b   : > { %1052 = vrot.lane.b32.xlu1 %v2972_v62, %s2575_s3  ;;  %v2996_v10 = vpack.i.bf16 %v2969_v60, %v2972_v62 }
 0x280   : > { %v1040_v63 = vpop.f32.mrf.mxu0 }
 0x281   : > { %v2975_v0 = vadd.f32 %v2402_v58, %v1040_v63 }
 0x283   : > { %1054 = vrot.lane.b32.xlu0 %v2975_v0, %s2575_s3 }
 0x2cd   : > { %v1051_v3 = vpop.permute.xlu2 %1050 }
 0x2ed   : > { %v1053_v2 = vpop.permute.xlu1 %1052 }
 0x2f5   : > { %v1055_v1 = vpop.permute.xlu0 %1054 }
 0x2f6   : > { %2198 = vmatpush.xpose.msk.msra.mxu1 %vm1056_vm15, %v1055_v1  ;;  %2293 = vmatpush.xpose.msk.msra.mxu3 %vm1056_vm15, %v1055_v1 }
 0x2fa   : > { %2199 = vmatpush.xpose.msk.msra.mxu1 %vm1056_vm15, %v1053_v2  ;;  %2294 = vmatpush.xpose.msk.msra.mxu3 %vm1056_vm15, %v1053_v2 }
 0x2fe   : > { %2200 = vmatpush.xpose.msk.msra.mxu1 %vm1056_vm15, %v1051_v3  ;;  %2295 = vmatpush.xpose.msk.msra.mxu3 %vm1056_vm15, %v1051_v3 }
 0x301   : > { %2201 = vmatmul.msk.f32.vlgmr.msra.gmra.mxu1 %vm1056_vm15, %v2969_v60  ;;  %2202 = vmatmul.msk.f32.vlgmr.msra.gmra.mxu3 %vm1056_vm15, %v2972_v62 }
 0x302   : > { %1363 = vmatpush.msrb.mxu1 %v1043_v34 }
 0x309   : > { %2203 = vmatmul.msk.f32.gmra.mxu3 %vm1056_vm15, %v2975_v0 }
 0x37e   : > { %v1086_v4 = vpop.f32.mrf.mxu1 }
 0x37f   : > { %v1096_v5 = vsel %vm1095_vm0, %v1086_v4, -inf }
 0x380   : > { %1097 = vmax.xlane.f32.xlu0 %v1096_v5 }
 0x384   : > { %v1089_v6 = vpop.f32.mrf.mxu3 }
 0x385   : > { %v1099_v7 = vsel %vm1095_vm0, %v1089_v6, -inf }
 0x386   : > { %1100 = vmax.xlane.f32.xlu2 %v1099_v7 }
 0x38c   : > { %v1092_v8 = vpop.f32.mrf.mxu3 }
 0x38d   : > { %v1103_v9 = vsel %vm1102_vm1, %v1092_v8, -inf }
 0x38e   : > { %1104 = vmax.xlane.f32.xlu1 %v1103_v9 }
 0x39e   : > { %1134 = vrot.lane.b32.xlu2 %v2975_v0, %s2576_s1 }
 0x3a6   : > { %1184 = vrot.lane.b32.xlu2 %v2972_v62, %s2577_s7 }
 0x3a7   : > { %2381 = vrot.lane.b32.xlu1 %v2996_v10, %s2576_s1  ;;  %s3395_s1 = scalar_lea.vmem %s3328_s9, %s2760_s0 }
 0x3ae   : > { %1176 = vrot.lane.b32.xlu2 %v2969_v60, %s2578_s17 }
 0x3af   : > { %1182 = vrot.lane.b32.xlu1 %v2969_v60, %s2577_s7 }
 0x3b6   : > { %1384 = vrot.lane.b32.xlu2 %v2975_v0, %s2579_s23 }
 0x3b7   : > { %1178 = vrot.lane.b32.xlu1 %v2972_v62, %s2578_s17 }
 0x3be   : > { %1382 = vrot.lane.b32.xlu2 %v2972_v62, %s2579_s23 }
 0x3bf   : > { %1180 = vrot.lane.b32.xlu1 %v2975_v0, %s2578_s17 }
 0x3c6   : > { %1546 = vrot.lane.b32.xlu2 %v2969_v60, %s2580_s27 }
 0x3c7   : > { %1380 = vrot.lane.b32.xlu1 %v2969_v60, %s2579_s23  ;;  %s3396_s23 = scalar_lea.vmem %s3329_s10, %s2760_s0 }
 0x3ce   : > { %1376 = vrot.lane.b32.xlu2 %v2972_v62, %s2581_s15 }
 0x3cf   : > { %1540 = vrot.lane.b32.xlu1 %v2969_v60, %s2582_s25 }
 0x3d6   : > { %1544 = vrot.lane.b32.xlu2 %v2975_v0, %s2582_s25 }
 0x3d7   : > { %1378 = vrot.lane.b32.xlu1 %v2975_v0, %s2581_s15 }
 0x3f3   : > { %v1098_v11 = vpop.xlane.xlu0 %1097 }
 0x3f4   : > { %v1106_v12 = vsub.f32 %v1086_v4, %v1098_v11 }
 0x3f6   : > { %v1109_v13 = vmul.f32 1.442695, %v1106_v12 }
 0x3f8   : > { %2416 = vpow2.f32 %v1109_v13 }
 0x3f9   : > { %v1101_v14 = vpop.xlane.xlu2 %1100 }
 0x3fa   : > { %v1107_v15 = vsub.f32 %v1089_v6, %v1101_v14 }
 0x3fc   : > { %v1111_v16 = vmul.f32 1.442695, %v1107_v15 }
 0x3fe   : > { %v2417_v17 = vpop.eup %2416  ;;  %2418 = vpow2.f32 %v1111_v16 }
 0x3ff   : > { %v1115_v18 = vsel %vm1095_vm0, %v2417_v17, 0.0 }
 0x400   : > { %1116 = vadd.xlane.f32.xlu0 %v1115_v18 }
 0x401   : > { %v1135_v19 = vpop.permute.xlu2 %1134  ;;  %v1105_v20 = vpop.xlane.xlu1 %1104 }
 0x402   : > { %v1108_v21 = vsub.f32 %v1092_v8, %v1105_v20  ;;  %2204 = vmatpush.msk.msra.mxu2 %vm1147_vm2, %v1135_v19 }
 0x404   : > { %v2419_v22 = vpop.eup %2418  ;;  %v1113_v23 = vmul.f32 1.442695, %v1108_v21 }
 0x405   : > { %v1118_v24 = vsel %vm1095_vm0, %v2419_v22, 0.0 }
 0x406   : > { %2420 = vpow2.f32 %v1113_v23 }
 0x408   : > { %1119 = vadd.xlane.f32.xlu0 %v1118_v24 }
 0x409   : > { %v1185_v36 = vpop.permute.xlu2 %1184 }
 0x40c   : > { %v2421_v25 = vpop.eup %2420 }
 0x40d   : > { %v1121_v26 = vsel %vm1102_vm1, %v2421_v25, 0.0 }
 0x410   : > { %1122 = vadd.xlane.f32.xlu0 %v1121_v26 }
 0x411   : > { %v1177_v42 = vpop.permute.xlu2 %1176 }
 0x419   : > { %v2382_v27 = vpop.permute.xlu1 %2381  ;;  %v1385_v44 = vpop.permute.xlu2 %1384 }
 0x41a   : > { %v2383_v28 = vunpack.i.l.bf16 %v2382_v27  ;;  %v2384_v29 = vunpack.i.h.bf16 %v2382_v27 }
 0x41c   : > { %1164 = vmatpush.msra.mxu2 %v2383_v28 }
 0x41e   : > { %1165 = vmatpush.msra.mxu2 %v2384_v29 }
 0x421   : > { %v1183_v39 = vpop.permute.xlu1 %1182  ;;  %v1383_v51 = vpop.permute.xlu2 %1382 }
 0x424   : > { %1186 = vrot.lane.b32.xlu0 %v2975_v0, %s2577_s7 }
 0x429   : > { %v1179_v43 = vpop.permute.xlu1 %1178  ;;  %v1547_v54 = vpop.permute.xlu2 %1546 }
 0x42c   : > { %1550 = vrot.lane.b32.xlu0 %v2975_v0, %s2580_s27 }
 0x431   : > { %v1181_v48 = vpop.permute.xlu1 %1180  ;;  %v1377_v58 = vpop.permute.xlu2 %1376 }
 0x434   : > { %1548 = vrot.lane.b32.xlu0 %v2972_v62, %s2580_s27 }
 0x439   : > { %v1381_v53 = vpop.permute.xlu1 %1380  ;;  %v1545_v3 = vpop.permute.xlu2 %1544 }
 0x43c   : > { %1374 = vrot.lane.b32.xlu0 %v2969_v60, %s2581_s15 }
 0x441   : > { %v1541_v56 = vpop.permute.xlu1 %1540 }
 0x444   : > { %1542 = vrot.lane.b32.xlu0 %v2972_v62, %s2582_s25  ;;  %s3397_s25 = scalar_lea.vmem %s3331_s12, %s2760_s0  ;;  %s3398_s0 = sld [smem:[#allocation8_spill]] }
 0x449   : > { %v1379_v59 = vpop.permute.xlu1 %1378 }
 0x44a   : > { %p2253_p1 = scmp.ne.s32.totalorder %s3398_s0, 1 }
 0x44b   : > { %s3402_s0 = sld [smem:[#allocation27_spill]] (!%p2253_p1) }
 0x473   : > { %v1117_v30 = vpop.xlane.xlu0 %1116 }
 0x474   : > { %2422 = vrcp.f32 %v1117_v30 }
 0x47a   : > { %v2423_v31 = vpop.eup %2422 }
 0x47b   : > { %v1120_v32 = vpop.xlane.xlu0 %1119  ;;  %v1127_v33 = vmul.f32 %v2423_v31, %v2417_v17 }
 0x47c   : > { %2424 = vrcp.f32 %v1120_v32 }
 0x47d   : > { %2205 = vmatmul.msk.f32.vlgmr.msra.gmra.mxu2 %vm1095_vm0, %v1127_v33 }
 0x482   : > { %v2425_v35 = vpop.eup %2424 }
 0x483   : > { %v1123_v37 = vpop.xlane.xlu0 %1122  ;;  %v1128_v38 = vmul.f32 %v2425_v35, %v2419_v22 }
 0x484   : > { %2426 = vrcp.f32 %v1123_v37 }
 0x485   : > { %2206 = vmatmul.msk.f32.gmra.mxu2 %vm1095_vm0, %v1128_v38 }
 0x48a   : > { %v2427_v40 = vpop.eup %2426 }
 0x48b   : > { %v1129_v41 = vmul.f32 %v2427_v40, %v2421_v25 }
 0x48d   : > { %2207 = vmatmul.msk.f32.gmra.mxu2 %vm1095_vm0, %v1129_v41 }
 0x496   : > { %v1187_v47 = vpop.permute.xlu0 %1186 }
 0x497   : > { %2208 = vmatpush.xpose.msk.msrb.mxu3 %vm1056_vm15, %v1187_v47 }
 0x49b   : > { %2209 = vmatpush.xpose.msk.msrb.mxu3 %vm1056_vm15, %v1185_v36 }
 0x49e   : > { %v1551_v50 = vpop.permute.xlu0 %1550 }
 0x49f   : > { %2210 = vmatpush.xpose.msk.msrb.mxu3 %vm1056_vm15, %v1183_v39  ;;  %2237 = vmatpush.xpose.msk.msra.mxu1 %vm1056_vm15, %v1551_v50 }
 0x4a2   : > { %2211 = vmatmul.msk.f32.vlgmr.msrb.gmra.mxu3 %vm1056_vm15, %v1177_v42 }
 0x4a3   : > { %2224 = vmatpush.xpose.msk.msra.mxu3 %vm1056_vm15, %v1385_v44 }
 0x4a6   : > { %v1549_v52 = vpop.permute.xlu0 %1548 }
 0x4a7   : > { %2225 = vmatpush.xpose.msk.msra.mxu3 %vm1056_vm15, %v1383_v51  ;;  %2238 = vmatpush.xpose.msk.msra.mxu1 %vm1056_vm15, %v1549_v52 }
 0x4aa   : > { %2212 = vmatmul.msk.f32.gmra.mxu3 %vm1056_vm15, %v1179_v43 }
 0x4ab   : > { %2226 = vmatpush.xpose.msk.msra.mxu3 %vm1056_vm15, %v1381_v53  ;;  %2239 = vmatpush.xpose.msk.msra.mxu1 %vm1056_vm15, %v1547_v54 }
 0x4ae   : > { %v1375_v55 = vpop.permute.xlu0 %1374 }
 0x4b2   : > { %2213 = vmatmul.msk.f32.gmra.mxu3 %vm1056_vm15, %v1181_v48 }
 0x4b6   : > { %v1543_v63 = vpop.permute.xlu0 %1542 }
 0x4ba   : > { %2227 = vmatmul.msk.f32.vlgmr.msra.gmra.mxu3 %vm1056_vm15, %v1375_v55 }
 0x4c2   : > { %2228 = vmatmul.msk.f32.gmra.mxu3 %vm1056_vm15, %v1377_v58 }
 0x4ca   : > { %2229 = vmatmul.msk.f32.gmra.mxu3 %vm1056_vm15, %v1379_v59 }
 0x500   : > { %v1167_v60 = vpop.f32.mrf.mxu2 }
 0x501   : > { %2221 = vmatmul.msk.f32.vlgmr.msrb.gmra.mxu1 %vm1056_vm15, %v1167_v60 }
 0x508   : > { %v1170_v61 = vpop.f32.mrf.mxu2 }
 0x509   : > { %2222 = vmatmul.msk.f32.gmra.mxu1 %vm1056_vm15, %v1170_v61 }
 0x510   : > { %v1173_v62 = vpop.f32.mrf.mxu2 }
 0x511   : > { %2223 = vmatmul.msk.f32.gmra.mxu1 %vm1056_vm15, %v1173_v62 }
 0x519   : > { %2240 = vmatmul.msk.f32.vlgmr.msra.gmra.mxu1 %vm1056_vm15, %v1541_v56 }
 0x521   : > { %2241 = vmatmul.msk.f32.gmra.mxu1 %vm1056_vm15, %v1543_v63 }
 0x525   : > { %v1217_v1 = vpop.f32.mrf.mxu3 }
 0x526   : > { %v1226_v2 = vsel %vm1095_vm0, %v1217_v1, -inf }
 0x527   : > { %1227 = vmax.xlane.f32.xlu0 %v1226_v2 }
 0x529   : > { %2242 = vmatmul.msk.f32.gmra.mxu1 %vm1056_vm15, %v1545_v3 }
 0x52d   : > { %v1220_v4 = vpop.f32.mrf.mxu3 }
 0x52e   : > { %v1229_v5 = vsel %vm1095_vm0, %v1220_v4, -inf }
 0x52f   : > { %1230 = vmax.xlane.f32.xlu1 %v1229_v5 }
 0x535   : > { %v1223_v6 = vpop.f32.mrf.mxu3 }
 0x536   : > { %v1232_v7 = vsel %vm1102_vm1, %v1223_v6, -inf }
 0x537   : > { %1233 = vmax.xlane.f32.xlu2 %v1232_v7 }
 0x53d   : > { %v1415_v8 = vpop.f32.mrf.mxu3 }
 0x53e   : > { %v1424_v9 = vsel %vm1095_vm0, %v1415_v8, -inf }
 0x53f   : > { %1425 = vmax.xlane.f32.xlu1 %v1424_v9 }
 0x545   : > { %v3062_v11 = vpop.f32.mrf.mxu3 }
 0x546   : > { %v1427_v12 = vsel %vm1095_vm0, %v3062_v11, -inf }
 0x547   : > { %1428 = vmax.xlane.f32.xlu0 %v1427_v12 }
 0x54d   : > { %v3066_v13 = vpop.f32.mrf.mxu3 }
 0x54e   : > { %v1430_v14 = vsel %vm1102_vm1, %v3066_v13, -inf }
 0x54f   : > { %1431 = vmax.xlane.f32.xlu2 %v1430_v14 }
 0x57e   : > { %v3070_v15 = vpop.f32.mrf.mxu1 }
 0x586   : > { %v3072_v16 = vpop.f32.mrf.mxu1 }
 0x58e   : > { %v3074_v17 = vpop.f32.mrf.mxu1 }
 0x596   : > { %v3076_v18 = vpop.f32.mrf.mxu1 }
 0x597   : > { %v1590_v33 = vsel %vm1095_vm0, %v3076_v18, -inf }
 0x59a   : > { %v1228_v19 = vpop.xlane.xlu0 %1227 }
 0x59b   : > { %v1235_v20 = vsub.f32 %v1217_v1, %v1228_v19 }
 0x59d   : > { %v1238_v21 = vmul.f32 1.442695, %v1235_v20 }
 0x59e   : > { %v1584_v22 = vpop.f32.mrf.mxu1 }
 0x59f   : > { %2428 = vpow2.f32 %v1238_v21  ;;  %v1593_v23 = vsel %vm1095_vm0, %v1584_v22, -inf }
 0x5a0   : > { %1594 = vmax.xlane.f32.xlu2 %v1593_v23 }
 0x5a2   : > { %v1231_v24 = vpop.xlane.xlu1 %1230 }
 0x5a3   : > { %v1236_v26 = vsub.f32 %v1220_v4, %v1231_v24 }
 0x5a5   : > { %v3079_v25 = vpop.eup %2428  ;;  %v1240_v30 = vmul.f32 1.442695, %v1236_v26 }
 0x5a6   : > { %v1587_v27 = vpop.f32.mrf.mxu1  ;;  %v1244_v28 = vsel %vm1095_vm0, %v3079_v25, 0.0 }
 0x5a7   : > { %1245 = vadd.xlane.f32.xlu0 %v1244_v28  ;;  %v1596_v29 = vsel %vm1102_vm1, %v1587_v27, -inf  ;;  %2430 = vpow2.f32 %v1240_v30 }
 0x5a8   : > { %1597 = vmax.xlane.f32.xlu1 %v1596_v29 }
 0x5aa   : > { %v1234_v31 = vpop.xlane.xlu2 %1233 }
 0x5ab   : > { %v1237_v32 = vsub.f32 %v1223_v6, %v1234_v31  ;;  %v1044_v31 = vld [vmem:[%s2788_s20 + $0x8] sm:$0xff] }
 0x5ac   : > { %1328 = vmatpush.msrb.mxu0 %v1044_v31 }
 0x5ad   : > { %v1242_v34 = vmul.f32 1.442695, %v1237_v32  ;;  %v3086_v35 = vpop.eup %2430 }
 0x5ae   : > { %v1247_v36 = vsel %vm1095_vm0, %v3086_v35, 0.0 }
 0x5af   : > { %1591 = vmax.xlane.f32.xlu0 %v1590_v33  ;;  %2432 = vpow2.f32 %v1242_v34 }
 0x5b2   : > { %v1426_v39 = vpop.xlane.xlu1 %1425 }
 0x5b3   : > { %v1433_v40 = vsub.f32 %v1415_v8, %v1426_v39 }
 0x5b5   : > { %v3091_v37 = vpop.eup %2432  ;;  %v1436_v41 = vmul.f32 1.442695, %v1433_v40 }
 0x5b6   : > { %v1250_v38 = vsel %vm1102_vm1, %v3091_v37, 0.0 }
 0x5b7   : > { %1248 = vadd.xlane.f32.xlu0 %v1247_v36  ;;  %2434 = vpow2.f32 %v1436_v41 }
 0x5b8   : > { %2386 = vrot.lane.b32.xlu2 %v2996_v10, %s2583_s26 }
 0x5ba   : > { %v1429_v47 = vpop.xlane.xlu0 %1428 }
 0x5bb   : > { %v1434_v28 = vsub.f32 %v3062_v11, %v1429_v47 }
 0x5bd   : > { %v3098_v42 = vpop.eup %2434  ;;  %v1438_v29 = vmul.f32 1.442695, %v1434_v28 }
 0x5be   : > { %v1442_v43 = vsel %vm1095_vm0, %v3098_v42, 0.0 }
 0x5bf   : > { %1251 = vadd.xlane.f32.xlu0 %v1250_v38 }
 0x5c0   : > { %1627 = vrot.lane.b32.xlu2 %v2975_v0, %s2584_s5 }
 0x5c1   : > { %1263 = vrot.lane.b32.xlu1 %v2975_v0, %s2583_s26 }
 0x5c2   : > { %v1432_v44 = vpop.xlane.xlu2 %1431 }
 0x5c3   : > { %v1435_v58 = vsub.f32 %v3066_v13, %v1432_v44 }
 0x5c5   : > { %v1440_v61 = vmul.f32 1.442695, %v1435_v58 }
 0x5d3   : > { %2391 = vrot.lane.b32.xlu0 %v2996_v10, %s2584_s5 }
 0x5eb   : > { %1443 = vadd.xlane.f32.xlu1 %v1442_v43 }
 0x613   : > { %v1595_v48 = vpop.xlane.xlu2 %1594 }
 0x614   : > { %v1600_v50 = vsub.f32 %v1584_v22, %v1595_v48 }
 0x616   : > { %v1604_v51 = vmul.f32 1.442695, %v1600_v50 }
 0x618   : > { %2436 = vpow2.f32 %v1604_v51 }
 0x61a   : > { %v1246_v52 = vpop.xlane.xlu0 %1245 }
 0x61b   : > { %v2387_v53 = vpop.permute.xlu2 %2386  ;;  %v1598_v54 = vpop.xlane.xlu1 %1597 }
 0x61c   : > { %v1601_v55 = vsub.f32 %v1587_v27, %v1598_v54  ;;  %v2388_v14 = vunpack.i.l.bf16 %v2387_v53 }
 0x61e   : > { %v3102_v56 = vpop.eup %2436  ;;  %v1606_v59 = vmul.f32 1.442695, %v1601_v55 }
 0x61f   : > { %v1611_v60 = vsel %vm1095_vm0, %v3102_v56, 0.0 }
 0x620   : > { %2438 = vpow2.f32 %v1606_v59  ;;  %1612 = vadd.xlane.f32.xlu2 %v1611_v60  ;;  %v1046_v59 = vld [vmem:[%s2788_s20 + $0x18] sm:$0xff]  ;;  %v1045_v60 = vld [vmem:[%s2788_s20 + $0x10] sm:$0xff] }
 0x621   : > { %2440 = vpow2.f32 %v1440_v61  ;;  %1526 = vmatpush.msra.mxu0 %v1045_v60  ;;  %v2404_v60 = vld [vmem:[%s3395_s1] ss:$0 sm:$0xff] }
 0x622   : > { %v1592_v62 = vpop.xlane.xlu0 %1591 }
 0x623   : > { %v1599_v63 = vsub.f32 %v3076_v18, %v1592_v62  ;;  %v1628_v1 = vpop.permute.xlu2 %1627  ;;  %v2389_v18 = vunpack.i.h.bf16 %v2387_v53 }
 0x624   : > { %2243 = vmatpush.msk.msrb.mxu3 %vm1147_vm2, %v1628_v1 }
 0x625   : > { %v1602_v2 = vmul.f32 1.442695, %v1599_v63 }
 0x626   : > { %v3109_v3 = vpop.eup %2438 }
 0x627   : > { %2442 = vpow2.f32 %v1602_v2  ;;  %v1614_v4 = vsel %vm1102_vm1, %v3109_v3, 0.0  ;;  %v3113_v5 = vpop.eup %2440 }
 0x628   : > { %1615 = vadd.xlane.f32.xlu1 %v1614_v4  ;;  %2444 = vrcp.f32 %v1246_v52  ;;  %v1448_v8 = vsel %vm1102_vm1, %v3113_v5, 0.0 }
 0x62a   : > { %v1249_v9 = vpop.xlane.xlu0 %1248 }
 0x62b   : > { %2446 = vrcp.f32 %v1249_v9 }
 0x62d   : > { %v2443_v6 = vpop.eup %2442 }
 0x62e   : > { %v1608_v7 = vsel %vm1095_vm0, %v2443_v6, 0.0  ;;  %v2445_v13 = vpop.eup %2444 }
 0x62f   : > { %1609 = vadd.xlane.f32.xlu0 %v1608_v7  ;;  %v1256_v19 = vmul.f32 %v2445_v13, %v3079_v25 }
 0x630   : > { %1449 = vadd.xlane.f32.xlu1 %v1448_v8 }
 0x631   : > { %v2447_v21 = vpop.eup %2446 }
 0x632   : > { %v1252_v20 = vpop.xlane.xlu0 %1251  ;;  %v1257_v22 = vmul.f32 %v2447_v21, %v3086_v35 }
 0x633   : > { %v1264_v12 = vpop.permute.xlu1 %1263  ;;  %2448 = vrcp.f32 %v1252_v20 }
 0x634   : > { %2214 = vmatpush.msk.msrb.mxu2 %vm1147_vm2, %v1264_v12  ;;  %2450 = vpow2.f32 %v1438_v29 }
 0x636   : > { %1292 = vmatpush.msrb.mxu2 %v2388_v14  ;;  %v2403_v14 = vld [vmem:[%s3394_s2] ss:$0 sm:$0xff] }
 0x638   : > { %1293 = vmatpush.msrb.mxu2 %v2389_v18 }
 0x639   : > { %2215 = vmatmul.msk.f32.vlgmr.msrb.gmra.mxu2 %vm1095_vm0, %v1256_v19  ;;  %v2449_v23 = vpop.eup %2448 }
 0x63a   : > { %v1258_v27 = vmul.f32 %v2449_v23, %v3091_v37  ;;  %v2451_v30 = vpop.eup %2450 }
 0x641   : > { %2216 = vmatmul.msk.f32.gmra.mxu2 %vm1095_vm0, %v1257_v22 }
 0x643   : > { %1461 = vrot.lane.b32.xlu0 %v2975_v0, %s2585_s18  ;;  %v1445_v0 = vsel %vm1095_vm0, %v2451_v30, 0.0 }
 0x645   : > { %v2392_v24 = vpop.permute.xlu0 %2391 }
 0x646   : > { %v2393_v26 = vunpack.i.l.bf16 %v2392_v24  ;;  %v2394_v25 = vunpack.i.h.bf16 %v2392_v24 }
 0x648   : > { %1656 = vmatpush.msrb.mxu3 %v2393_v26 }
 0x649   : > { %2217 = vmatmul.msk.f32.gmra.mxu2 %vm1095_vm0, %v1258_v27 }
 0x64a   : > { %1657 = vmatpush.msrb.mxu3 %v2394_v25 }
 0x64b   : > { %2396 = vrot.lane.b32.xlu0 %v2996_v10, %s2585_s18  ;;  %s3399_s18 = sld [smem:[#allocation26_spill]] (!%p2253_p1) }
 0x65e   : > { %v1444_v33 = vpop.xlane.xlu1 %1443 }
 0x675   : > { %1446 = vadd.xlane.f32.xlu0 %v1445_v0 }
 0x693   : > { %v1613_v34 = vpop.xlane.xlu2 %1612 }
 0x69b   : > { %v1616_v10 = vpop.xlane.xlu1 %1615 }
 0x6a2   : > { %v1610_v32 = vpop.xlane.xlu0 %1609 }
 0x6a3   : > { %2452 = vrcp.f32 %v1610_v32  ;;  %v1450_v54 = vpop.xlane.xlu1 %1449 }
 0x6a4   : > { %2454 = vrcp.f32 %v1613_v34 }
 0x6a5   : > { %2456 = vrcp.f32 %v1616_v10 }
 0x6a6   : > { %2458 = vrcp.f32 %v1444_v33 }
 0x6a9   : > { %v2453_v35 = vpop.eup %2452 }
 0x6aa   : > { %v1620_v36 = vmul.f32 %v2453_v35, %v2443_v6  ;;  %v2455_v37 = vpop.eup %2454 }
 0x6ab   : > { %v1621_v11 = vmul.f32 %v2455_v37, %v3102_v56  ;;  %v2457_v39 = vpop.eup %2456 }
 0x6ac   : > { %2244 = vmatmul.msk.f32.vlgmr.msrb.gmra.mxu3 %vm1095_vm0, %v1620_v36  ;;  %v1622_v40 = vmul.f32 %v2457_v39, %v3109_v3  ;;  %v2459_v44 = vpop.eup %2458 }
 0x6ad   : > { %v1454_v50 = vmul.f32 %v2459_v44, %v3098_v42  ;;  %v1799_v44 = vld [vmem:[%s2805_s22 + $0x18] sm:$0xff] }
 0x6b4   : > { %2245 = vmatmul.msk.f32.gmra.mxu3 %vm1095_vm0, %v1621_v11 }
 0x6b5   : > { %v1462_v38 = vpop.permute.xlu0 %1461 }
 0x6b6   : > { %2230 = vmatpush.msk.msra.mxu2 %vm1147_vm2, %v1462_v38 }
 0x6bc   : > { %v1295_v41 = vpop.f32.mrf.mxu2  ;;  %2246 = vmatmul.msk.f32.gmra.mxu3 %vm1095_vm0, %v1622_v40 }
 0x6bd   : > { %2218 = vmatmul.msk.f32.vlgmr.msrb.gmra.mxu0 %vm1056_vm15, %v1295_v41  ;;  %v2397_v43 = vpop.permute.xlu0 %2396 }
 0x6be   : > { %v2398_v47 = vunpack.i.l.bf16 %v2397_v43  ;;  %v2399_v48 = vunpack.i.h.bf16 %v2397_v43  ;;  %1825 = vmatpush.msrb.mxu0 %v1799_v44  ;;  %v1866_v44 = vld [vmem:[%s2819_s29] sm:$0xff] }
 0x6c0   : > { %1490 = vmatpush.msra.mxu2 %v2398_v47  ;;  %v1798_v47 = vld [vmem:[%s2805_s22 + $0x10] sm:$0xff] }
 0x6c1   : > { %1826 = vmatpush.msrb.mxu0 %v1798_v47  ;;  %v2406_v47 = vld [vmem:[%s3397_s25] ss:$0 sm:$0xff]  ;;  %s3401_s25 = sld [smem:[#allocation25_spill]] (!%p2253_p1) }
 0x6c2   : > { %1491 = vmatpush.msra.mxu2 %v2399_v48  ;;  %v1797_v48 = vld [vmem:[%s2805_s22 + $0x8] sm:$0xff] }
 0x6c3   : > { %2231 = vmatmul.msk.f32.vlgmr.msra.gmra.mxu2 %vm1095_vm0, %v1454_v50  ;;  %v1796_v50 = vld [vmem:[%s2805_s22] sm:$0xff]  ;;  %1827 = vmatpush.msrb.mxu0 %v1797_v48 }
 0x6c4   : > { %v1298_v51 = vpop.f32.mrf.mxu2  ;;  %1692 = vmatpush.msrb.mxu2 %v1046_v59 }
 0x6c5   : > { %2219 = vmatmul.msk.f32.gmra.mxu0 %vm1056_vm15, %v1298_v51 }
 0x6c6   : > { %1828 = vmatpush.msrb.mxu0 %v1796_v50 }
 0x6cc   : > { %v1301_v52 = vpop.f32.mrf.mxu2 }
 0x6cd   : > { %2220 = vmatmul.msk.f32.gmra.mxu0 %vm1056_vm15, %v1301_v52 }
 0x6e8   : > { %v1447_v53 = vpop.xlane.xlu0 %1446 }
 0x6e9   : > { %2460 = vrcp.f32 %v1447_v53 }
 0x6ea   : > { %2462 = vrcp.f32 %v1450_v54 }
 0x6ef   : > { %v2461_v55 = vpop.eup %2460 }
 0x6f0   : > { %v1455_v56 = vmul.f32 %v2461_v55, %v2451_v30  ;;  %v2463_v42 = vpop.eup %2462 }
 0x6f1   : > { %v1456_v58 = vmul.f32 %v2463_v42, %v3113_v5 }
 0x6f2   : > { %2232 = vmatmul.msk.f32.gmra.mxu2 %vm1095_vm0, %v1455_v56 }
 0x6fa   : > { %2233 = vmatmul.msk.f32.gmra.mxu2 %vm1095_vm0, %v1456_v58 }
 0x72f   : > { %v1659_v61 = vpop.f32.mrf.mxu3 }
 0x730   : > { %2247 = vmatmul.msk.f32.vlgmr.msrb.gmra.mxu2 %vm1056_vm15, %v1659_v61 }
 0x737   : > { %v1662_v62 = vpop.f32.mrf.mxu3 }
 0x738   : > { %2248 = vmatmul.msk.f32.gmra.mxu2 %vm1056_vm15, %v1662_v62 }
 0x73a   : > { %v1330_v4 = vpop.f32.mrf.mxu0 }
 0x73b   : > { %v1366_v7 = vadd.f32 %v3070_v15, %v1330_v4 }
 0x73f   : > { %v1665_v63 = vpop.f32.mrf.mxu3 }
 0x740   : > { %2249 = vmatmul.msk.f32.gmra.mxu2 %vm1056_vm15, %v1665_v63  ;;  %v2405_v63 = vld [vmem:[%s3396_s23] ss:$0 sm:$0xff]  ;;  %s3400_s23 = sld [smem:[#allocation24_spill]] (!%p2253_p1) }
 0x742   : > { %v1333_v5 = vpop.f32.mrf.mxu0 }
 0x743   : > { %v1369_v21 = vadd.f32 %v3072_v16, %v1333_v5 }
 0x746   : > { %v1493_v1 = vpop.f32.mrf.mxu2 }
 0x747   : > { %2234 = vmatmul.msk.f32.vlgmr.msra.gmra.mxu0 %vm1056_vm15, %v1493_v1 }
 0x74a   : > { %v1336_v6 = vpop.f32.mrf.mxu0 }
 0x74b   : > { %v1372_v27 = vadd.f32 %v3074_v17, %v1336_v6  ;;  %v1881_v6 = vld [vmem:[%s2819_s29 + $0x78] sm:$0xff] }
 0x74c   : > { %1886 = vmatpush.msrb.mxu1 %v1881_v6 }
 0x775   : > { %v1496_v2 = vpop.f32.mrf.mxu2 }
 0x776   : > { %2235 = vmatmul.msk.f32.gmra.mxu0 %vm1056_vm15, %v1496_v2 }
 0x77d   : > { %v1499_v3 = vpop.f32.mrf.mxu2 }
 0x77e   : > { %2236 = vmatmul.msk.f32.gmra.mxu0 %vm1056_vm15, %v1499_v3 }
 0x7b3   : > { %v1694_v12 = vpop.f32.mrf.mxu2 }
 0x7bb   : > { %v1697_v15 = vpop.f32.mrf.mxu2 }
 0x7c3   : > { %v1700_v30 = vpop.f32.mrf.mxu2 }
 0x7c4   : > { %v1528_v8 = vpop.f32.mrf.mxu0 }
 0x7c5   : > { %v1537_v9 = vadd.f32 %v1528_v8, %v1366_v7  ;;  %v1880_v7 = vld [vmem:[%s2819_s29 + $0x70] sm:$0xff]  ;;  %v1879_v8 = vld [vmem:[%s2819_s29 + $0x68] sm:$0xff] }
 0x7c6   : > { %1887 = vmatpush.msrb.mxu1 %v1880_v7 }
 0x7c7   : > { %v1703_v13 = vadd.f32 %v1694_v12, %v1537_v9 }
 0x7c8   : > { %1888 = vmatpush.msrb.mxu1 %v1879_v8 }
 0x7c9   : > { %v1706_v18 = vadd.f32 %v1703_v13, %v2916_v45  ;;  %v1878_v13 = vld [vmem:[%s2819_s29 + $0x60] sm:$0xff] }
 0x7ca   : > { %1889 = vmatpush.msrb.mxu1 %v1878_v13 }
 0x7cb   : > { %v3159_v19 = vadd.f32 %v2403_v14, %v1706_v18 }
 0x7cd   : > { %v1718_v20 = vsel %vm913_vm3, %v3159_v19, 0.0 }
 0x7ce   : > { %1719 = vadd.xlane.f32.xlu2 %v1718_v20 }
 0x7f3   : > { %v1531_v22 = vpop.f32.mrf.mxu0 }
 0x7f4   : > { %v1538_v23 = vadd.f32 %v1531_v22, %v1369_v21 }
 0x7f6   : > { %v1704_v24 = vadd.f32 %v1697_v15, %v1538_v23 }
 0x7f8   : > { %v1707_v26 = vadd.f32 %v1704_v24, %v2924_v49 }
 0x7fa   : > { %v3166_v25 = vadd.f32 %v2403_v14, %v1707_v26 }
 0x7fb   : > { %v1534_v28 = vpop.f32.mrf.mxu0 }
 0x7fc   : > { %v1539_v45 = vadd.f32 %v1534_v28, %v1372_v27  ;;  %v1721_v29 = vsel %vm913_vm3, %v3166_v25, 0.0 }
 0x7fd   : > { %1722 = vadd.xlane.f32.xlu1 %v1721_v29 }
 0x7fe   : > { %v1705_v0 = vadd.f32 %v1700_v30, %v1539_v45 }
 0x800   : > { %v1708_v16 = vadd.f32 %v1705_v0, %v2918_v46 }
 0x802   : > { %v3171_v31 = vadd.f32 %v2403_v14, %v1708_v16 }
 0x804   : > { %v1724_v32 = vsel %vm920_vm4, %v3171_v31, 0.0 }
 0x805   : > { %1725 = vadd.xlane.f32.xlu2 %v1724_v32 }
 0x841   : > { %v1720_v49 = vpop.xlane.xlu2 %1719 }
 0x842   : > { %v1727_v17 = vmul.f32 %v1720_v49, %v2928_v57 }
 0x844   : > { %v1730_v33 = vsub.f32 %v3159_v19, %v1727_v17 }
 0x846   : > { %v1733_v34 = vmul.f32 %v1730_v33, %v1730_v33 }
 0x848   : > { %v1736_v35 = vsel %vm913_vm3, %v1733_v34, 0.0 }
 0x849   : > { %1737 = vadd.xlane.f32.xlu1 %v1736_v35  ;;  %v1877_v35 = vld [vmem:[%s2819_s29 + $0x58] sm:$0xff] }
 0x84a   : > { %1890 = vmatpush.msrb.mxu1 %v1877_v35 }
 0x870   : > { %v1723_v36 = vpop.xlane.xlu1 %1722 }
 0x871   : > { %v1728_v46 = vmul.f32 %v1723_v36, %v2928_v57  ;;  %v1876_v36 = vld [vmem:[%s2819_s29 + $0x50] sm:$0xff] }
 0x872   : > { %1891 = vmatpush.msrb.mxu1 %v1876_v36 }
 0x873   : > { %v3180_v10 = vsub.f32 %v3166_v25, %v1728_v46  ;;  %v1875_v46 = vld [vmem:[%s2819_s29 + $0x48] sm:$0xff] }
 0x874   : > { %1892 = vmatpush.msrb.mxu1 %v1875_v46 }
 0x875   : > { %v1734_v37 = vmul.f32 %v3180_v10, %v3180_v10 }
 0x877   : > { %v1739_v11 = vsel %vm913_vm3, %v1734_v37, 0.0  ;;  %v1873_v37 = vld [vmem:[%s2819_s29 + $0x38] sm:$0xff] }
 0x878   : > { %1740 = vadd.xlane.f32.xlu2 %v1739_v11  ;;  %v1726_v38 = vpop.xlane.xlu2 %1725  ;;  %v1872_v11 = vld [vmem:[%s2819_s29 + $0x30] sm:$0xff] }
 0x879   : > { %v1729_v39 = vmul.f32 %v1726_v38, %v2928_v57  ;;  %v1871_v38 = vld [vmem:[%s2819_s29 + $0x28] sm:$0xff] }
 0x87b   : > { %v3187_v40 = vsub.f32 %v3171_v31, %v1729_v39  ;;  %v1870_v39 = vld [vmem:[%s2819_s29 + $0x20] sm:$0xff] }
 0x87d   : > { %v1735_v41 = vmul.f32 %v3187_v40, %v3187_v40 }
 0x87f   : > { %v1742_v43 = vsel %vm920_vm4, %v1735_v41, 0.0  ;;  %v1868_v41 = vld [vmem:[%s2819_s29 + $0x10] sm:$0xff] }
 0x880   : > { %1743 = vadd.xlane.f32.xlu1 %v1742_v43  ;;  %v1867_v43 = vld [vmem:[%s2819_s29 + $0x8] sm:$0xff] }
 0x8bc   : > { %v1738_v51 = vpop.xlane.xlu1 %1737 }
 0x8bd   : > { %v1745_v52 = vmul.f32 %v1738_v51, %v2928_v57 }
 0x8bf   : > { %v1748_v53 = vadd.f32 1e-06, %v1745_v52 }
 0x8c1   : > { %2464 = vrsqrt.f32 %v1748_v53  ;;  %vm1757_vm6 = vweird.f32 %v1748_v53 }
 0x8c7   : > { %v2465_v54 = vpop.eup %2464 }
 0x8c8   : > { %v1752_v55 = vmul.f32 %v2465_v54, %v1748_v53  ;;  %vm1758_vm5 = vweird.f32 %v2465_v54 }
 0x8c9   : > { %vm1759_vm7 = vmor %vm1757_vm6, %vm1758_vm5 }
 0x8ca   : > { %v1753_v56 = vmul.f32 %v2465_v54, %v1752_v55 }
 0x8cc   : > { %v1754_v42 = vmul.f32 0.5, %v1753_v56 }
 0x8ce   : > { %v1755_v58 = vsub.f32 1.5, %v1754_v42 }
 0x8d0   : > { %v1756_v59 = vmul.f32 %v2465_v54, %v1755_v58 }
 0x8d2   : > { %v1760_v61 = vsel %vm1759_vm7, %v2465_v54, %v1756_v59 }
 0x8d3   : > { %v1781_v62 = vmul.f32 %v1760_v61, %v1730_v33 }
 0x8d5   : > { %v1787_v1 = vmul.f32 %v2404_v60, %v1781_v62 }
 0x8d7   : > { %v1793_v2 = vadd.f32 %v2405_v63, %v1787_v1 }
 0x8d9   : > { %2250 = vmatmul.msk.f32.vlgmr.msrb.gmra.mxu0 %vm913_vm3, %v1793_v2 }
 0x8eb   : > { %v1741_v3 = vpop.xlane.xlu2 %1740 }
 0x8ec   : > { %v1746_v4 = vmul.f32 %v1741_v3, %v2928_v57 }
 0x8ee   : > { %v1749_v5 = vadd.f32 1e-06, %v1746_v4 }
 0x8f0   : > { %2466 = vrsqrt.f32 %v1749_v5  ;;  %vm1767_vm9 = vweird.f32 %v1749_v5 }
 0x8f3   : > { %v1744_v9 = vpop.xlane.xlu1 %1743 }
 0x8f4   : > { %v1747_v12 = vmul.f32 %v1744_v9, %v2928_v57 }
 0x8f6   : > { %v2467_v14 = vpop.eup %2466  ;;  %v1750_v18 = vadd.f32 1e-06, %v1747_v12 }
 0x8f7   : > { %v1762_v20 = vmul.f32 %v2467_v14, %v1749_v5  ;;  %vm1768_vm8 = vweird.f32 %v2467_v14 }
 0x8f8   : > { %2468 = vrsqrt.f32 %v1750_v18  ;;  %vm1769_vm10 = vmor %vm1767_vm9, %vm1768_vm8  ;;  %vm1777_vm12 = vweird.f32 %v1750_v18 }
 0x8f9   : > { %v1763_v21 = vmul.f32 %v2467_v14, %v1762_v20 }
 0x8fb   : > { %v1764_v15 = vmul.f32 0.5, %v1763_v21 }
 0x8fd   : > { %v1765_v22 = vsub.f32 1.5, %v1764_v15 }
 0x8fe   : > { %v2469_v23 = vpop.eup %2468 }
 0x8ff   : > { %v1766_v24 = vmul.f32 %v2467_v14, %v1765_v22  ;;  %v1772_v26 = vmul.f32 %v2469_v23, %v1750_v18  ;;  %vm1778_vm11 = vweird.f32 %v2469_v23 }
 0x900   : > { %vm1779_vm13 = vmor %vm1777_vm12, %vm1778_vm11 }
 0x901   : > { %v1770_v27 = vsel %vm1769_vm10, %v2467_v14, %v1766_v24  ;;  %v1773_v28 = vmul.f32 %v2469_v23, %v1772_v26  ;;  %v2407_v24 = vld [vmem:[%s803_s19] ss:$0 sm:$0xff] }
 0x902   : > { %v1782_v45 = vmul.f32 %v1770_v27, %v3180_v10  ;;  %v1874_v10 = vld [vmem:[%s2819_s29 + $0x40] sm:$0xff] }
 0x903   : > { %v1774_v29 = vmul.f32 0.5, %v1773_v28  ;;  %1893 = vmatpush.msrb.mxu1 %v1874_v10 }
 0x904   : > { %v1788_v30 = vmul.f32 %v2404_v60, %v1782_v45 }
 0x905   : > { %v1775_v0 = vsub.f32 1.5, %v1774_v29  ;;  %1894 = vmatpush.msrb.mxu1 %v1873_v37 }
 0x906   : > { %v1794_v16 = vadd.f32 %v2405_v63, %v1788_v30 }
 0x907   : > { %v1776_v32 = vmul.f32 %v2469_v23, %v1775_v0  ;;  %1895 = vmatpush.msrb.mxu1 %v1872_v11 }
 0x908   : > { %2251 = vmatmul.msk.f32.gmra.mxu0 %vm913_vm3, %v1794_v16 }
 0x909   : > { %v1780_v49 = vsel %vm1779_vm13, %v2469_v23, %v1776_v32  ;;  %1896 = vmatpush.msrb.mxu1 %v1871_v38 }
 0x90a   : > { %v1783_v17 = vmul.f32 %v1780_v49, %v3187_v40  ;;  %v1869_v40 = vld [vmem:[%s2819_s29 + $0x18] sm:$0xff] }
 0x90b   : > { %1897 = vmatpush.msrb.mxu1 %v1870_v39 }
 0x90c   : > { %v1789_v33 = vmul.f32 %v2404_v60, %v1783_v17 }
 0x90d   : > { %1898 = vmatpush.msrb.mxu1 %v1869_v40 }
 0x90e   : > { %v1795_v34 = vadd.f32 %v2405_v63, %v1789_v33 }
 0x90f   : > { %1899 = vmatpush.msrb.mxu1 %v1868_v41 }
 0x910   : > { %2252 = vmatmul.msk.f32.gmra.mxu0 %vm913_vm3, %v1795_v34 }
 0x911   : > { %1900 = vmatpush.msrb.mxu1 %v1867_v43 }
 0x913   : > { %1901 = vmatpush.msrb.mxu1 %v1866_v44 }
 0x956   : > { %v1830_v48 = vpop.f32.mrf.mxu0 }
 0x957   : > { %v1831_v50 = vadd.f32 %v2406_v47, %v1830_v48 }
 0x959   : > { %v1842_v51 = vmul.f32 0.044715, %v1831_v50  ;;  %v1839_v42 = vmul.f32 0.5, %v1831_v50 }
 0x95b   : > { %v1845_v52 = vmul.f32 %v1842_v51, %v1831_v50 }
 0x95d   : > { %v1848_v53 = vmul.f32 %v1845_v52, %v1831_v50 }
 0x95f   : > { %v1851_v54 = vadd.f32 %v1848_v53, %v1831_v50 }
 0x961   : > { %v1854_v55 = vmul.f32 0.7978846, %v1851_v54 }
 0x963   : > { %2470 = vtanh.f32 %v1854_v55 }
 0x969   : > { %v2471_v56 = vpop.eup %2470 }
 0x96a   : > { %v1860_v58 = vadd.f32 1.0, %v2471_v56 }
 0x96c   : > { %v1863_v59 = vmul.f32 %v1860_v58, %v1839_v42 }
 0x96e   : > { %1902 = vmatmul.f32.vlgmr.msrb.gmra.mxu1 %v1863_v59 }
 0x985   : > { %v1833_v60 = vpop.f32.mrf.mxu0 }
 0x986   : > { %v1834_v61 = vadd.f32 %v2406_v47, %v1833_v60 }
 0x988   : > { %v1843_v62 = vmul.f32 0.044715, %v1834_v61  ;;  %v1840_v14 = vmul.f32 0.5, %v1834_v61 }
 0x98a   : > { %v1846_v63 = vmul.f32 %v1843_v62, %v1834_v61 }
 0x98c   : > { %v1849_v1 = vmul.f32 %v1846_v63, %v1834_v61 }
 0x98d   : > { %v1836_v2 = vpop.f32.mrf.mxu0 }
 0x98e   : > { %v1837_v3 = vadd.f32 %v2406_v47, %v1836_v2  ;;  %v1852_v4 = vadd.f32 %v1849_v1, %v1834_v61 }
 0x990   : > { %v1855_v5 = vmul.f32 0.7978846, %v1852_v4  ;;  %v1844_v6 = vmul.f32 0.044715, %v1837_v3  ;;  %v1841_v15 = vmul.f32 0.5, %v1837_v3 }
 0x992   : > { %2472 = vtanh.f32 %v1855_v5  ;;  %v1847_v7 = vmul.f32 %v1844_v6, %v1837_v3 }
 0x994   : > { %v1850_v8 = vmul.f32 %v1847_v7, %v1837_v3 }
 0x996   : > { %v1853_v9 = vadd.f32 %v1850_v8, %v1837_v3 }
 0x998   : > { %v2473_v12 = vpop.eup %2472  ;;  %v1856_v13 = vmul.f32 0.7978846, %v1853_v9 }
 0x999   : > { %v1861_v18 = vadd.f32 1.0, %v2473_v12 }
 0x99a   : > { %2474 = vtanh.f32 %v1856_v13 }
 0x99b   : > { %v1864_v20 = vmul.f32 %v1861_v18, %v1840_v14 }
 0x99d   : > { %1905 = vmatmul.f32.gmra.mxu1 %v1864_v20 }
 0x9a0   : > { %v2475_v21 = vpop.eup %2474 }
 0x9a1   : > { %v1862_v22 = vadd.f32 1.0, %v2475_v21 }
 0x9a3   : > { %v1865_v23 = vmul.f32 %v1862_v22, %v1841_v15 }
 0x9a5   : > { %1908 = vmatmul.f32.gmra.mxu1 %v1865_v23 }
 0x9eb   : > { %v1903_v26 = vpop.f32.mrf.mxu1 }
 0x9ec   : > { %v1904_v27 = vadd.f32 %v2407_v24, %v1903_v26 }
 0x9ee   : > { %v1912_v28 = vadd.f32 %v1904_v27, %v3159_v19 }
 0x9f0   : > { %1915 = vst.msk [vmem:[#allocation2] sm:$0xff] %vm913_vm3, %v1912_v28 }
 0xa1a   : > { %v1906_v45 = vpop.f32.mrf.mxu1 }
 0xa1b   : > { %v1907_v29 = vadd.f32 %v2407_v24, %v1906_v45 }
 0xa1d   : > { %v1913_v30 = vadd.f32 %v1907_v29, %v3166_v25 }
 0xa1f   : > { %1916 = vst.msk [vmem:[#allocation2 + $0x8] sm:$0xff] %vm913_vm3, %v1913_v30 }
 0xa22   : > { %v1909_v0 = vpop.f32.mrf.mxu1 }
 0xa23   : > { %v1910_v16 = vadd.f32 %v2407_v24, %v1909_v0  ;;  %1921 = sbr.rel (%p2253_p1) target bundleno = 2997 (0xbb5), region = 104 }
 0xa25   : > { %v1914_v32 = vadd.f32 %v1910_v16, %v3171_v31 }
 0xa27   : > { %1917 = vst.msk [vmem:[#allocation2 + $0x10] sm:$0x1] %vm920_vm4, %v1914_v32 }
 0xa28   : > { %v1924_v49 = vsel %vm920_vm4, %v1912_v28, 0.0  ;;  %v1951_v31 = vld [vmem:[%s3399_s18 + $0x18] sm:$0xff]  ;;  %v1950_v35 = vld [vmem:[%s3399_s18 + $0x10] sm:$0xff]  ;;  %v1949_v36 = vld [vmem:[%s3399_s18 + $0x8] sm:$0xff]  ;;  %vm1976_vm0 = vcmask 73728  }
 0xa29   : > { %1925 = vadd.xlane.f32.xlu0 %v1924_v49  ;;  %1968 = vmatpush.msra.mxu0 %v1951_v31  ;;  %v1948_v46 = vld [vmem:[%s3399_s18] sm:$0xff] }
 0xa2a   : > { %v1922_v47 = vld [vmem:[%s3400_s23] sm:$0x1] }
 0xa2b   : > { %1969 = vmatpush.msra.mxu0 %v1950_v35  ;;  %v1952_v53 = vld [vmem:[%s3402_s0] sm:$0x1] }
 0xa2d   : > { %1970 = vmatpush.msra.mxu0 %v1949_v36 }
 0xa2f   : > { %1971 = vmatpush.msra.mxu0 %v1948_v46 }
 0xa9c   : > { %v1926_v19 = vpop.xlane.xlu0 %1925 }
 0xa9d   : > { %v1927_v17 = vmul.f32 %v1926_v19, %v2928_v57 }
 0xa9f   : > { %v1928_v33 = vsub.f32 %v1912_v28, %v1927_v17 }
 0xaa1   : > { %v1929_v34 = vmul.f32 %v1928_v33, %v1928_v33 }
 0xaa3   : > { %v1930_v25 = vsel %vm920_vm4, %v1929_v34, 0.0 }
 0xaa4   : > { %1931 = vadd.xlane.f32.xlu0 %v1930_v25 }
 0xb17   : > { %v1932_v10 = vpop.xlane.xlu0 %1931 }
 0xb18   : > { %v1933_v37 = vmul.f32 %v1932_v10, %v2928_v57  ;;  %v1923_v57 = vld [vmem:[%s3401_s25] sm:$0x1] }
 0xb1a   : > { %v1934_v11 = vadd.f32 1e-06, %v1933_v37 }
 0xb1c   : > { %2476 = vrsqrt.f32 %v1934_v11  ;;  %vm1941_vm14 = vweird.f32 %v1934_v11 }
 0xb22   : > { %v2477_v38 = vpop.eup %2476 }
 0xb23   : > { %v1936_v39 = vmul.f32 %v2477_v38, %v1934_v11  ;;  %vm1942_vm4 = vweird.f32 %v2477_v38 }
 0xb24   : > { %vm1943_vm15 = vmor %vm1941_vm14, %vm1942_vm4 }
 0xb25   : > { %v1937_v40 = vmul.f32 %v2477_v38, %v1936_v39 }
 0xb27   : > { %v1938_v41 = vmul.f32 0.5, %v1937_v40 }
 0xb29   : > { %v1939_v43 = vsub.f32 1.5, %v1938_v41 }
 0xb2b   : > { %v1940_v44 = vmul.f32 %v2477_v38, %v1939_v43 }
 0xb2d   : > { %v1944_v48 = vsel %vm1943_vm15, %v2477_v38, %v1940_v44 }
 0xb2e   : > { %v1945_v50 = vmul.f32 %v1944_v48, %v1928_v33 }
 0xb30   : > { %v1946_v51 = vmul.f32 %v1945_v50, %v1922_v47 }
 0xb32   : > { %v1947_v52 = vadd.f32 %v1946_v51, %v1923_v57 }
 0xb34   : > { %2254 = vmatmul.msk.f32.vlgmr.msra.gmra.mxu0 %vm913_vm3, %v1947_v52 }
 0xbb1   : > { %v1973_v54 = vpop.f32.mrf.mxu0 }
 0xbb2   : > { %v1974_v55 = vadd.f32 %v1973_v54, %v1952_v53 }
 0xbb4   : > { %1977 = vst.msk [vmem:[%s2823_s16] sm:$0x1] %vm1976_vm0, %v1974_v55 }
 0xbb5 PF: > { %s3403_s19 = sld [smem:[#allocation9_spill]]  ;;  %s1989_s1 = sshll.u32 %s2823_s16, 4  ;;  %s1990_s1 = int_to_ptr.vmem [resolvable:$true] %s1989_s1 }
 0xbb6   : > { %s3404_s21 = sld [smem:[#allocation28_spill]]  ;;  %s3407_s17 = sand.u32 1, %s2548_s30  }
 0xbb7   : > { %s1979_s23 = scalar_lea.sflag [#allocation4], %s3407_s17 }
 0xbbc   : > { %s3405_s3 = smov %s3404_s21  ;;  %s1987_s22 = scalar_lea.hbm %s3404_s21, %s3403_s19 }
 0xbbd   : > { %s1991_s7 = sshll.u32 %s1987_s22, 4  ;;  %s2498_s26 = scalar_lea.hbm %s3405_s3, 2  ;;  %s1992_s7 = int_to_ptr.hbm [resolvable:$true] %s1991_s7 }
 0xbbe   : > { %s2492_s27 = sshra.s32 %s1992_s7, 4  ;;  %s2493_s27 = int_to_ptr.hbm [resolvable:$true] %s2492_s27 }
 0xbbf   : > { %s2494_s15 = scalar_lea.hbm %s2493_s27, 1  ;;  %p2499_p6 = scmp.lt.s32.totalorder %s2493_s27, %s3405_s3 }
 0xbc0   : > { %p2495_p2 = scmp.ne.s32.totalorder %s2493_s27, %s2494_s15  ;;  %p2500_p7 = scmp.lt.s32.totalorder %s2498_s26, %s2494_s15 }
 0xbc2   : > { %p2496_p4 = pnand %p2495_p2, %p2735_p3  ;;  %p2501_p8 = por %p2500_p7, %p2499_p6 }
 0xbc4   : > { %p2497_p5 = pneg %p2496_p4 }
 0xbc6   : > { %p2502_p10 = pnand %p2501_p8, %p2497_p5 }
 0xbc8   : > { %2505 = shalt.err (!%p2502_p10)
}
 0xbc9   : > { %2297 = dma.vmem_to_hbm [thread:$0]  (%p2735_p3), %s1990_s1, 16, %s1992_s7, %s1979_s23  }
 0xbca PF: > { %s3408_s16 = sld [smem:[#allocation12_spill]] }
 0xbcb   : > { %s3409_s19 = sld [smem:[#allocation6_spill]] }
 0xbd0   : > { %p2303_p11 = scmp.ge.s32.totalorder %s3408_s16, 2 }
 0xbd1   : > { %s2003_s21 = sand.u32 1, %s3409_s19  }
 0xbd2   : > { %p2300_p12 = pnand %p2303_p11, %p2745_p9  ;;  %s2004_s22 = scalar_lea.sflag [#allocation4], %s2003_s21 }
 0xbd4   : > { %p2301_p13 = pneg %p2300_p12 }
 0xbd6   : > { %2539 = dma.done.wait (%p2301_p13), %s2004_s22, 16  }
 0xbd7   : > { %2541 = vsyncadd (%p2301_p13), %s2004_s22, 4294967280  ;;  %s32_s23 = sadd.s32 1, %s3408_s16   ;;  %s3411_s17 = sld [smem:[#allocation7_spill]] }
 0xbd8   : > { %p29_p0 = scmp.ge.s32.totalorder %s32_s23, 6   ;;  %s3412_s20 = sld [smem:[#allocation17_spill]] }
 0xbd9   : > { %s3413_s21 = sld [smem:[#allocation10_spill]]  ;;  %s3417_s0 = smov %s2548_s30 }
 0xbda   : > { %s3414_s1 = sld [smem:[#allocation11_spill]]  ;;  %31 = sbr.rel (!%p29_p0) target bundleno = 17 (0x11), region = 175 }
 0xbdb   : > { %s3415_s22 = sld [smem:[#allocation13_spill]] }
 0xbdc   : > { %s3416_s2 = sld [smem:[#allocation15_spill]] }
 0xbdd   : > { %s3418_s30 = smov %s3411_s17 }
 0xbdf   :  { %2009 = vsyncpa [#allocation4], 1 }
 0xbe0   :  { %2011 = vsyncpa [#allocation4 + $0x1], 1 }

</bundles_post_ra>
